<compile_context>
chip_gen: v7x
topology: tpu7x:2x2x1
jax: 0.10.0
libtpu: 0.0.40
codegen_flags: <defaults>
</compile_context>

<pallas_src>
import functools

import jax
import jax.numpy as jnp
from jax.experimental import pallas as pl
from jax.experimental.pallas import tpu as pltpu


# ---------------------------------------------------------------------------
# Fused kernel: one image per grid step, everything in VMEM, channels-first.
# ---------------------------------------------------------------------------
def _level_fuse_kernel(
    x_ref, y_ref, masks_ref,
    wexp_ref, bexp_ref, wdw_ref, wproj_ref, bproj_ref, wg_ref, bg_ref,
    out_ref,
    *, H, W, C,
):
    HW = H * W
    f32 = jnp.float32

    x = x_ref[0]                       # (C, HW)  channels-first, lane-dense
    y = y_ref[0]                       # (C, HW)

    m = masks_ref[...]                 # (4, HW)  0/1 halo-validity masks
    m_l, m_r = m[0:1, :], m[1:2, :]    # left  (j-1) / right (j+1) valid
    m_u, m_d = m[2:3, :], m[3:4, :]    # upper (i-1) / lower (i+1) valid

    def dwise(h, wdw):
        # h: (C, HW) expanded activations; wdw: (C, 9), column k is tap
        # (dh = k // 3, dw = k % 3).  out[i,j] = sum_k w * h[i+dh-1, j+dw-1].
        s_l = m_l * pltpu.roll(h, shift=1, axis=1)        # h[i, j-1]
        s_r = m_r * pltpu.roll(h, shift=HW - 1, axis=1)   # h[i, j+1]

        def wcol(k):                                      # per-channel tap weight
            return wdw[:, k:k + 1]                        # (C, 1)

        def taps(r):                                      # one kernel row, dh = r-1
            return wcol(3 * r) * s_l + wcol(3 * r + 1) * h + wcol(3 * r + 2) * s_r

        acc = taps(1)                                                   # dh = 0
        acc = acc + m_u * pltpu.roll(taps(0), shift=W, axis=1)          # dh = -1
        acc = acc + m_d * pltpu.roll(taps(2), shift=HW - W, axis=1)     # dh = +1
        return jnp.clip(acc, 0.0, 6.0)

    # ---- rfb0 (irb): 1x1 expand + ReLU6 -> dw3x3 + ReLU6 -> 1x1 project
    #      + residual.  Processed per channel half to bound vreg pressure.
    xr = x + bproj_ref[...]
    for half in range(2):
        lo, hi = half * C, (half + 1) * C
        h = jnp.dot(wexp_ref[lo:hi, :], x, preferred_element_type=f32)
        h = jnp.clip(h + bexp_ref[lo:hi, :], 0.0, 6.0)
        h = dwise(h, wdw_ref[lo:hi, :])
        xr = xr + jnp.dot(wproj_ref[:, lo:hi], h, preferred_element_type=f32)

    # ---- mlgf gated fusion (fused gate matmul; gate maps are dead outputs).
    yx = jnp.concatenate([y, xr], axis=0)                        # (2C, HW)
    g = jnp.dot(wg_ref[...], yx, preferred_element_type=f32)
    g = jax.nn.sigmoid(g + bg_ref[...])                          # (2C, HW)
    out = g[:C, :] * y + g[C:, :] * xr

    # rfb1 = nn.Identity()
    out_ref[0] = out.astype(out_ref.dtype)


# ---------------------------------------------------------------------------
# Wrapper
# ---------------------------------------------------------------------------
@jax.jit
def level_fuse_forward(y, x, params):
    """y, x: (N, C, H, W) float32  ->  (N, C, H, W) float32."""
    N, C, H, W = x.shape
    HW = H * W
    C2 = 2 * C

    # NCHW is already channels-first: only reshapes, no transposes.
    x2 = x.reshape(N, C, HW)
    y2 = y.reshape(N, C, HW)

    # Channels-first weight orientation (tiny arrays; folded by XLA).
    w_exp_t = params["w_exp"].T                         # (2C, C)
    b_exp_c = params["b_exp"].reshape(C2, 1)
    w_dw_c = params["w_dw"].reshape(9, C2).T            # (2C, 9), col k = tap (k//3, k%3)
    w_proj_t = params["w_proj"].T                       # (C, 2C)
    b_proj_c = params["b_proj"].reshape(C, 1)
    w_g_t = jnp.concatenate(
        [params["w_gy"].T, params["w_gx"].T], axis=1)   # (2C, 2C) fused gate weight
    b_g_c = params["b_g"].reshape(C2, 1)

    # 0/1 halo-validity masks over the flattened spatial (lane) axis.
    pos = jnp.arange(HW, dtype=jnp.int32)
    colj = pos % W
    rowi = pos // W
    masks = jnp.stack([
        colj >= 1,          # left  neighbour (j-1) valid
        colj <= W - 2,      # right neighbour (j+1) valid
        rowi >= 1,          # upper row (i-1) valid
        rowi <= H - 2,      # lower row (i+1) valid
    ], axis=0).astype(x.dtype)                           # (4, HW)

    kernel = functools.partial(_level_fuse_kernel, H=H, W=W, C=C)

    out2 = pl.pallas_call(
        kernel,
        out_shape=jax.ShapeDtypeStruct((N, C, HW), x.dtype),
        grid_spec=pltpu.PrefetchScalarGridSpec(
            num_scalar_prefetch=0,
            grid=(N,),
            in_specs=[
                pl.BlockSpec((1, C, HW), lambda n: (n, 0, 0)),   # x
                pl.BlockSpec((1, C, HW), lambda n: (n, 0, 0)),   # y
                pl.BlockSpec((4, HW), lambda n: (0, 0)),         # edge masks
                pl.BlockSpec((C2, C), lambda n: (0, 0)),         # w_exp^T
                pl.BlockSpec((C2, 1), lambda n: (0, 0)),         # b_exp
                pl.BlockSpec((C2, 9), lambda n: (0, 0)),         # w_dw (per-channel)
                pl.BlockSpec((C, C2), lambda n: (0, 0)),         # w_proj^T
                pl.BlockSpec((C, 1), lambda n: (0, 0)),          # b_proj
                pl.BlockSpec((C2, C2), lambda n: (0, 0)),        # w_g^T (fused)
                pl.BlockSpec((C2, 1), lambda n: (0, 0)),         # b_g
            ],
            out_specs=pl.BlockSpec((1, C, HW), lambda n: (n, 0, 0)),
        ),
        compiler_params=pltpu.CompilerParams(
            dimension_semantics=("parallel",),
        ),
    )(x2, y2, masks, w_exp_t, b_exp_c, w_dw_c, w_proj_t, b_proj_c, w_g_t, b_g_c)

    return out2.reshape(N, C, H, W)


# ---------------------------------------------------------------------------
# Params + pure-jnp reference
# ---------------------------------------------------------------------------
def init_params(key, in_feats):
    C = in_feats
    ks = jax.random.split(key, 6)
    s = 0.1
    return {
        # rfb0: inverted residual block (BN folded as identity at init)
        "w_exp": s * jax.random.normal(ks[0], (C, 2 * C), jnp.float32),
        "b_exp": jnp.zeros((2 * C,), jnp.float32),
        "w_dw": s * jax.random.normal(ks[1], (3, 3, 2 * C), jnp.float32),
        "w_proj": s * jax.random.normal(ks[2], (2 * C, C), jnp.float32),
        "b_proj": jnp.zeros((C,), jnp.float32),
        # fuse ('mlgf'): gate 1x1 conv on concat([y, x]) -> 2C gates
        "w_gy": s * jax.random.normal(ks[3], (C, 2 * C), jnp.float32),
        "w_gx": s * jax.random.normal(ks[4], (C, 2 * C), jnp.float32),
        "b_g": s * jax.random.normal(ks[5], (2 * C,), jnp.float32),
    }


def reference_forward(y, x, p):
    N, C, H, W = x.shape
    xh = jnp.transpose(x, (0, 2, 3, 1))
    yh = jnp.transpose(y, (0, 2, 3, 1))
    h = jnp.clip(xh @ p["w_exp"] + p["b_exp"], 0.0, 6.0)
    hp = jnp.pad(h, ((0, 0), (1, 1), (1, 1), (0, 0)))
    acc = jnp.zeros_like(h)
    for dh in range(3):
        for dw in range(3):
            acc = acc + hp[:, dh:dh + H, dw:dw + W, :] * p["w_dw"][dh, dw, :]
    h = jnp.clip(acc, 0.0, 6.0)
    xr = (h @ p["w_proj"] + p["b_proj"]) + xh
    g = jax.nn.sigmoid(yh @ p["w_gy"] + xr @ p["w_gx"] + p["b_g"])
    out = g[..., :C] * yh + g[..., C:] * xr
    return jnp.transpose(out, (0, 3, 1, 2))


if __name__ == "__main__":
    N, C, H, W = 2, 32, 16, 16   # in_feats = 32
    key = jax.random.PRNGKey(0)
    ky, kx, kp = jax.random.split(key, 3)
    y = jax.random.normal(ky, (N, C, H, W), jnp.float32)
    x = jax.random.normal(kx, (N, C, H, W), jnp.float32)
    params = init_params(kp, C)

    out = level_fuse_forward(y, x, params)
    out = jax.block_until_ready(out)
    assert out.shape == (N, C, H, W), out.shape

    ref = reference_forward(y, x, params)
    assert jnp.allclose(out, ref, atol=1e-2, rtol=1e-2), \
        float(jnp.max(jnp.abs(out - ref)))

    print("KERNEL_OK")
</pallas_src>

<mosaic_0001>
module attributes {stable_mosaic.version = 11 : i64} {
  func.func @_level_fuse_kernel(%arg0: i32, %arg1: memref<1x32x256xf32, #tpu.memory_space<vmem>>, %arg2: memref<1x32x256xf32, #tpu.memory_space<vmem>>, %arg3: memref<4x256xf32, #tpu.memory_space<vmem>>, %arg4: memref<64x32xf32, #tpu.memory_space<vmem>>, %arg5: memref<64x1xf32, #tpu.memory_space<vmem>>, %arg6: memref<64x9xf32, #tpu.memory_space<vmem>>, %arg7: memref<32x64xf32, #tpu.memory_space<vmem>>, %arg8: memref<32x1xf32, #tpu.memory_space<vmem>>, %arg9: memref<64x64xf32, #tpu.memory_space<vmem>>, %arg10: memref<64x1xf32, #tpu.memory_space<vmem>>, %arg11: memref<1x32x256xf32, #tpu.memory_space<vmem>>) attributes {dimension_semantics = [#tpu.dimension_semantics<parallel>], iteration_bounds = array<i64: 2>, scalar_prefetch = 0 : i64, scratch_operands = 0 : i64, tpu.core_type = #tpu.core_type<tc>, window_params = [{transform_indices = @transform_0, window_bounds = array<i64: 1, 32, 256>}, {transform_indices = @transform_1, window_bounds = array<i64: 1, 32, 256>}, {pipeline_mode = #tpu.pipeline_mode<synchronous>, transform_indices = @transform_2, window_bounds = array<i64: 4, 256>}, {pipeline_mode = #tpu.pipeline_mode<synchronous>, transform_indices = @transform_3, window_bounds = array<i64: 64, 32>}, {pipeline_mode = #tpu.pipeline_mode<synchronous>, transform_indices = @transform_4, window_bounds = array<i64: 64, 1>}, {pipeline_mode = #tpu.pipeline_mode<synchronous>, transform_indices = @transform_5, window_bounds = array<i64: 64, 9>}, {pipeline_mode = #tpu.pipeline_mode<synchronous>, transform_indices = @transform_6, window_bounds = array<i64: 32, 64>}, {pipeline_mode = #tpu.pipeline_mode<synchronous>, transform_indices = @transform_7, window_bounds = array<i64: 32, 1>}, {pipeline_mode = #tpu.pipeline_mode<synchronous>, transform_indices = @transform_8, window_bounds = array<i64: 64, 64>}, {pipeline_mode = #tpu.pipeline_mode<synchronous>, transform_indices = @transform_9, window_bounds = array<i64: 64, 1>}, {transform_indices = @transform_10, window_bounds = array<i64: 1, 32, 256>}]} {
    %c0 = arith.constant 0 : index
    %c0_0 = arith.constant 0 : index
    %c0_1 = arith.constant 0 : index
    %0 = vector.load %arg1[%c0, %c0_0, %c0_1] : memref<1x32x256xf32, #tpu.memory_space<vmem>>, vector<1x32x256xf32>
    %1 = vector.shape_cast %0 : vector<1x32x256xf32> to vector<32x256xf32>
    %c0_2 = arith.constant 0 : index
    %c0_3 = arith.constant 0 : index
    %c0_4 = arith.constant 0 : index
    %2 = vector.load %arg2[%c0_2, %c0_3, %c0_4] : memref<1x32x256xf32, #tpu.memory_space<vmem>>, vector<1x32x256xf32>
    %3 = vector.shape_cast %2 : vector<1x32x256xf32> to vector<32x256xf32>
    %c0_5 = arith.constant 0 : index
    %c0_6 = arith.constant 0 : index
    %4 = vector.load %arg3[%c0_5, %c0_6] : memref<4x256xf32, #tpu.memory_space<vmem>>, vector<4x256xf32>
    %5 = vector.extract_strided_slice %4 {offsets = [0, 0], sizes = [1, 256], strides = [1, 1]} : vector<4x256xf32> to vector<1x256xf32>
    %6 = vector.extract_strided_slice %4 {offsets = [1, 0], sizes = [1, 256], strides = [1, 1]} : vector<4x256xf32> to vector<1x256xf32>
    %7 = vector.extract_strided_slice %4 {offsets = [2, 0], sizes = [1, 256], strides = [1, 1]} : vector<4x256xf32> to vector<1x256xf32>
    %8 = vector.extract_strided_slice %4 {offsets = [3, 0], sizes = [1, 256], strides = [1, 1]} : vector<4x256xf32> to vector<1x256xf32>
    %c0_7 = arith.constant 0 : index
    %c0_8 = arith.constant 0 : index
    %9 = vector.load %arg8[%c0_7, %c0_8] : memref<32x1xf32, #tpu.memory_space<vmem>>, vector<32x1xf32>
    %10 = vector.broadcast %9 : vector<32x1xf32> to vector<32x256xf32>
    %11 = arith.addf %1, %10 : vector<32x256xf32>
    %c0_9 = arith.constant 0 : index
    %c0_10 = arith.constant 0 : index
    %12 = vector.load %arg4[%c0_9, %c0_10] : memref<64x32xf32, #tpu.memory_space<vmem>>, vector<32x32xf32>
    %cst = arith.constant dense<0.000000e+00> : vector<32x256xf32>
    %13 = tpu.matmul %12, %1, %cst {dimension_numbers = #tpu.dot_dimension_numbers<[1], [0], [0], [1], [0, 0, 1, 1], [], []>} : vector<32x32xf32>, vector<32x256xf32>, vector<32x256xf32> -> vector<32x256xf32>
    %c0_11 = arith.constant 0 : index
    %c0_12 = arith.constant 0 : index
    %14 = vector.load %arg5[%c0_11, %c0_12] : memref<64x1xf32, #tpu.memory_space<vmem>>, vector<32x1xf32>
    %15 = vector.broadcast %14 : vector<32x1xf32> to vector<32x256xf32>
    %16 = arith.addf %13, %15 : vector<32x256xf32>
    %cst_13 = arith.constant 0.000000e+00 : f32
    %cst_14 = arith.constant 6.000000e+00 : f32
    %17 = vector.broadcast %cst_13 : f32 to vector<32x256xf32>
    %18 = arith.maximumf %17, %16 : vector<32x256xf32>
    %19 = vector.broadcast %cst_14 : f32 to vector<32x256xf32>
    %20 = arith.minimumf %19, %18 : vector<32x256xf32>
    %c0_15 = arith.constant 0 : index
    %c0_16 = arith.constant 0 : index
    %21 = vector.load %arg6[%c0_15, %c0_16] : memref<64x9xf32, #tpu.memory_space<vmem>>, vector<32x9xf32>
    %c1_i32 = arith.constant 1 : i32
    %22 = tpu.dynamic_rotate %20 by %c1_i32 dim 1 : vector<32x256xf32>, i32 -> vector<32x256xf32>
    %23 = vector.broadcast %5 : vector<1x256xf32> to vector<32x256xf32>
    %24 = arith.mulf %23, %22 : vector<32x256xf32>
    %c255_i32 = arith.constant 255 : i32
    %25 = tpu.dynamic_rotate %20 by %c255_i32 dim 1 : vector<32x256xf32>, i32 -> vector<32x256xf32>
    %26 = vector.broadcast %6 : vector<1x256xf32> to vector<32x256xf32>
    %27 = arith.mulf %26, %25 : vector<32x256xf32>
    %28 = vector.extract_strided_slice %21 {offsets = [0, 3], sizes = [32, 1], strides = [1, 1]} : vector<32x9xf32> to vector<32x1xf32>
    %29 = vector.broadcast %28 : vector<32x1xf32> to vector<32x256xf32>
    %30 = arith.mulf %29, %24 : vector<32x256xf32>
    %31 = vector.extract_strided_slice %21 {offsets = [0, 4], sizes = [32, 1], strides = [1, 1]} : vector<32x9xf32> to vector<32x1xf32>
    %32 = vector.broadcast %31 : vector<32x1xf32> to vector<32x256xf32>
    %33 = arith.mulf %32, %20 : vector<32x256xf32>
    %34 = arith.addf %30, %33 : vector<32x256xf32>
    %35 = vector.extract_strided_slice %21 {offsets = [0, 5], sizes = [32, 1], strides = [1, 1]} : vector<32x9xf32> to vector<32x1xf32>
    %36 = vector.broadcast %35 : vector<32x1xf32> to vector<32x256xf32>
    %37 = arith.mulf %36, %27 : vector<32x256xf32>
    %38 = arith.addf %34, %37 : vector<32x256xf32>
    %39 = vector.extract_strided_slice %21 {offsets = [0, 0], sizes = [32, 1], strides = [1, 1]} : vector<32x9xf32> to vector<32x1xf32>
    %40 = vector.broadcast %39 : vector<32x1xf32> to vector<32x256xf32>
    %41 = arith.mulf %40, %24 : vector<32x256xf32>
    %42 = vector.extract_strided_slice %21 {offsets = [0, 1], sizes = [32, 1], strides = [1, 1]} : vector<32x9xf32> to vector<32x1xf32>
    %43 = vector.broadcast %42 : vector<32x1xf32> to vector<32x256xf32>
    %44 = arith.mulf %43, %20 : vector<32x256xf32>
    %45 = arith.addf %41, %44 : vector<32x256xf32>
    %46 = vector.extract_strided_slice %21 {offsets = [0, 2], sizes = [32, 1], strides = [1, 1]} : vector<32x9xf32> to vector<32x1xf32>
    %47 = vector.broadcast %46 : vector<32x1xf32> to vector<32x256xf32>
    %48 = arith.mulf %47, %27 : vector<32x256xf32>
    %49 = arith.addf %45, %48 : vector<32x256xf32>
    %c16_i32 = arith.constant 16 : i32
    %50 = tpu.dynamic_rotate %49 by %c16_i32 dim 1 : vector<32x256xf32>, i32 -> vector<32x256xf32>
    %51 = vector.broadcast %7 : vector<1x256xf32> to vector<32x256xf32>
    %52 = arith.mulf %51, %50 : vector<32x256xf32>
    %53 = arith.addf %38, %52 : vector<32x256xf32>
    %54 = vector.extract_strided_slice %21 {offsets = [0, 6], sizes = [32, 1], strides = [1, 1]} : vector<32x9xf32> to vector<32x1xf32>
    %55 = vector.broadcast %54 : vector<32x1xf32> to vector<32x256xf32>
    %56 = arith.mulf %55, %24 : vector<32x256xf32>
    %57 = vector.extract_strided_slice %21 {offsets = [0, 7], sizes = [32, 1], strides = [1, 1]} : vector<32x9xf32> to vector<32x1xf32>
    %58 = vector.broadcast %57 : vector<32x1xf32> to vector<32x256xf32>
    %59 = arith.mulf %58, %20 : vector<32x256xf32>
    %60 = arith.addf %56, %59 : vector<32x256xf32>
    %61 = vector.extract_strided_slice %21 {offsets = [0, 8], sizes = [32, 1], strides = [1, 1]} : vector<32x9xf32> to vector<32x1xf32>
    %62 = vector.broadcast %61 : vector<32x1xf32> to vector<32x256xf32>
    %63 = arith.mulf %62, %27 : vector<32x256xf32>
    %64 = arith.addf %60, %63 : vector<32x256xf32>
    %c240_i32 = arith.constant 240 : i32
    %65 = tpu.dynamic_rotate %64 by %c240_i32 dim 1 : vector<32x256xf32>, i32 -> vector<32x256xf32>
    %66 = vector.broadcast %8 : vector<1x256xf32> to vector<32x256xf32>
    %67 = arith.mulf %66, %65 : vector<32x256xf32>
    %68 = arith.addf %53, %67 : vector<32x256xf32>
    %cst_17 = arith.constant 0.000000e+00 : f32
    %cst_18 = arith.constant 6.000000e+00 : f32
    %69 = vector.broadcast %cst_17 : f32 to vector<32x256xf32>
    %70 = arith.maximumf %69, %68 : vector<32x256xf32>
    %71 = vector.broadcast %cst_18 : f32 to vector<32x256xf32>
    %72 = arith.minimumf %71, %70 : vector<32x256xf32>
    %c0_19 = arith.constant 0 : index
    %c0_20 = arith.constant 0 : index
    %73 = vector.load %arg7[%c0_19, %c0_20] : memref<32x64xf32, #tpu.memory_space<vmem>>, vector<32x32xf32>
    %cst_21 = arith.constant dense<0.000000e+00> : vector<32x256xf32>
    %74 = tpu.matmul %73, %72, %cst_21 {dimension_numbers = #tpu.dot_dimension_numbers<[1], [0], [0], [1], [0, 0, 1, 1], [], []>} : vector<32x32xf32>, vector<32x256xf32>, vector<32x256xf32> -> vector<32x256xf32>
    %75 = arith.addf %11, %74 : vector<32x256xf32>
    %c32 = arith.constant 32 : index
    %c0_22 = arith.constant 0 : index
    %76 = vector.load %arg4[%c32, %c0_22] : memref<64x32xf32, #tpu.memory_space<vmem>>, vector<32x32xf32>
    %cst_23 = arith.constant dense<0.000000e+00> : vector<32x256xf32>
    %77 = tpu.matmul %76, %1, %cst_23 {dimension_numbers = #tpu.dot_dimension_numbers<[1], [0], [0], [1], [0, 0, 1, 1], [], []>} : vector<32x32xf32>, vector<32x256xf32>, vector<32x256xf32> -> vector<32x256xf32>
    %c32_24 = arith.constant 32 : index
    %c0_25 = arith.constant 0 : index
    %78 = vector.load %arg5[%c32_24, %c0_25] : memref<64x1xf32, #tpu.memory_space<vmem>>, vector<32x1xf32>
    %79 = vector.broadcast %78 : vector<32x1xf32> to vector<32x256xf32>
    %80 = arith.addf %77, %79 : vector<32x256xf32>
    %cst_26 = arith.constant 0.000000e+00 : f32
    %cst_27 = arith.constant 6.000000e+00 : f32
    %81 = vector.broadcast %cst_26 : f32 to vector<32x256xf32>
    %82 = arith.maximumf %81, %80 : vector<32x256xf32>
    %83 = vector.broadcast %cst_27 : f32 to vector<32x256xf32>
    %84 = arith.minimumf %83, %82 : vector<32x256xf32>
    %c32_28 = arith.constant 32 : index
    %c0_29 = arith.constant 0 : index
    %85 = vector.load %arg6[%c32_28, %c0_29] : memref<64x9xf32, #tpu.memory_space<vmem>>, vector<32x9xf32>
    %c1_i32_30 = arith.constant 1 : i32
    %86 = tpu.dynamic_rotate %84 by %c1_i32_30 dim 1 : vector<32x256xf32>, i32 -> vector<32x256xf32>
    %87 = vector.broadcast %5 : vector<1x256xf32> to vector<32x256xf32>
    %88 = arith.mulf %87, %86 : vector<32x256xf32>
    %c255_i32_31 = arith.constant 255 : i32
    %89 = tpu.dynamic_rotate %84 by %c255_i32_31 dim 1 : vector<32x256xf32>, i32 -> vector<32x256xf32>
    %90 = vector.broadcast %6 : vector<1x256xf32> to vector<32x256xf32>
    %91 = arith.mulf %90, %89 : vector<32x256xf32>
    %92 = vector.extract_strided_slice %85 {offsets = [0, 3], sizes = [32, 1], strides = [1, 1]} : vector<32x9xf32> to vector<32x1xf32>
    %93 = vector.broadcast %92 : vector<32x1xf32> to vector<32x256xf32>
    %94 = arith.mulf %93, %88 : vector<32x256xf32>
    %95 = vector.extract_strided_slice %85 {offsets = [0, 4], sizes = [32, 1], strides = [1, 1]} : vector<32x9xf32> to vector<32x1xf32>
    %96 = vector.broadcast %95 : vector<32x1xf32> to vector<32x256xf32>
    %97 = arith.mulf %96, %84 : vector<32x256xf32>
    %98 = arith.addf %94, %97 : vector<32x256xf32>
    %99 = vector.extract_strided_slice %85 {offsets = [0, 5], sizes = [32, 1], strides = [1, 1]} : vector<32x9xf32> to vector<32x1xf32>
    %100 = vector.broadcast %99 : vector<32x1xf32> to vector<32x256xf32>
    %101 = arith.mulf %100, %91 : vector<32x256xf32>
    %102 = arith.addf %98, %101 : vector<32x256xf32>
    %103 = vector.extract_strided_slice %85 {offsets = [0, 0], sizes = [32, 1], strides = [1, 1]} : vector<32x9xf32> to vector<32x1xf32>
    %104 = vector.broadcast %103 : vector<32x1xf32> to vector<32x256xf32>
    %105 = arith.mulf %104, %88 : vector<32x256xf32>
    %106 = vector.extract_strided_slice %85 {offsets = [0, 1], sizes = [32, 1], strides = [1, 1]} : vector<32x9xf32> to vector<32x1xf32>
    %107 = vector.broadcast %106 : vector<32x1xf32> to vector<32x256xf32>
    %108 = arith.mulf %107, %84 : vector<32x256xf32>
    %109 = arith.addf %105, %108 : vector<32x256xf32>
    %110 = vector.extract_strided_slice %85 {offsets = [0, 2], sizes = [32, 1], strides = [1, 1]} : vector<32x9xf32> to vector<32x1xf32>
    %111 = vector.broadcast %110 : vector<32x1xf32> to vector<32x256xf32>
    %112 = arith.mulf %111, %91 : vector<32x256xf32>
    %113 = arith.addf %109, %112 : vector<32x256xf32>
    %c16_i32_32 = arith.constant 16 : i32
    %114 = tpu.dynamic_rotate %113 by %c16_i32_32 dim 1 : vector<32x256xf32>, i32 -> vector<32x256xf32>
    %115 = vector.broadcast %7 : vector<1x256xf32> to vector<32x256xf32>
    %116 = arith.mulf %115, %114 : vector<32x256xf32>
    %117 = arith.addf %102, %116 : vector<32x256xf32>
    %118 = vector.extract_strided_slice %85 {offsets = [0, 6], sizes = [32, 1], strides = [1, 1]} : vector<32x9xf32> to vector<32x1xf32>
    %119 = vector.broadcast %118 : vector<32x1xf32> to vector<32x256xf32>
    %120 = arith.mulf %119, %88 : vector<32x256xf32>
    %121 = vector.extract_strided_slice %85 {offsets = [0, 7], sizes = [32, 1], strides = [1, 1]} : vector<32x9xf32> to vector<32x1xf32>
    %122 = vector.broadcast %121 : vector<32x1xf32> to vector<32x256xf32>
    %123 = arith.mulf %122, %84 : vector<32x256xf32>
    %124 = arith.addf %120, %123 : vector<32x256xf32>
    %125 = vector.extract_strided_slice %85 {offsets = [0, 8], sizes = [32, 1], strides = [1, 1]} : vector<32x9xf32> to vector<32x1xf32>
    %126 = vector.broadcast %125 : vector<32x1xf32> to vector<32x256xf32>
    %127 = arith.mulf %126, %91 : vector<32x256xf32>
    %128 = arith.addf %124, %127 : vector<32x256xf32>
    %c240_i32_33 = arith.constant 240 : i32
    %129 = tpu.dynamic_rotate %128 by %c240_i32_33 dim 1 : vector<32x256xf32>, i32 -> vector<32x256xf32>
    %130 = vector.broadcast %8 : vector<1x256xf32> to vector<32x256xf32>
    %131 = arith.mulf %130, %129 : vector<32x256xf32>
    %132 = arith.addf %117, %131 : vector<32x256xf32>
    %cst_34 = arith.constant 0.000000e+00 : f32
    %cst_35 = arith.constant 6.000000e+00 : f32
    %133 = vector.broadcast %cst_34 : f32 to vector<32x256xf32>
    %134 = arith.maximumf %133, %132 : vector<32x256xf32>
    %135 = vector.broadcast %cst_35 : f32 to vector<32x256xf32>
    %136 = arith.minimumf %135, %134 : vector<32x256xf32>
    %c0_36 = arith.constant 0 : index
    %c32_37 = arith.constant 32 : index
    %137 = vector.load %arg7[%c0_36, %c32_37] : memref<32x64xf32, #tpu.memory_space<vmem>>, vector<32x32xf32>
    %cst_38 = arith.constant dense<0.000000e+00> : vector<32x256xf32>
    %138 = tpu.matmul %137, %136, %cst_38 {dimension_numbers = #tpu.dot_dimension_numbers<[1], [0], [0], [1], [0, 0, 1, 1], [], []>} : vector<32x32xf32>, vector<32x256xf32>, vector<32x256xf32> -> vector<32x256xf32>
    %139 = arith.addf %75, %138 : vector<32x256xf32>
    %140 = tpu.concatenate %3, %139 in 0 : vector<32x256xf32>, vector<32x256xf32> -> vector<64x256xf32>
    %c0_39 = arith.constant 0 : index
    %c0_40 = arith.constant 0 : index
    %141 = vector.load %arg9[%c0_39, %c0_40] : memref<64x64xf32, #tpu.memory_space<vmem>>, vector<64x64xf32>
    %cst_41 = arith.constant dense<0.000000e+00> : vector<64x256xf32>
    %142 = tpu.matmul %141, %140, %cst_41 {dimension_numbers = #tpu.dot_dimension_numbers<[1], [0], [0], [1], [0, 0, 1, 1], [], []>} : vector<64x64xf32>, vector<64x256xf32>, vector<64x256xf32> -> vector<64x256xf32>
    %c0_42 = arith.constant 0 : index
    %c0_43 = arith.constant 0 : index
    %143 = vector.load %arg10[%c0_42, %c0_43] : memref<64x1xf32, #tpu.memory_space<vmem>>, vector<64x1xf32>
    %144 = vector.broadcast %143 : vector<64x1xf32> to vector<64x256xf32>
    %145 = arith.addf %142, %144 : vector<64x256xf32>
    %146 = arith.negf %145 : vector<64x256xf32>
    %147 = math.exp %146 : vector<64x256xf32>
    %cst_44 = arith.constant 1.000000e+00 : f32
    %148 = vector.broadcast %cst_44 : f32 to vector<64x256xf32>
    %149 = arith.addf %148, %147 : vector<64x256xf32>
    %150 = arith.divf %148, %149 : vector<64x256xf32>
    %151 = vector.extract_strided_slice %150 {offsets = [0, 0], sizes = [32, 256], strides = [1, 1]} : vector<64x256xf32> to vector<32x256xf32>
    %152 = arith.mulf %151, %3 : vector<32x256xf32>
    %153 = vector.extract_strided_slice %150 {offsets = [32, 0], sizes = [32, 256], strides = [1, 1]} : vector<64x256xf32> to vector<32x256xf32>
    %154 = arith.mulf %153, %139 : vector<32x256xf32>
    %155 = arith.addf %152, %154 : vector<32x256xf32>
    %c0_45 = arith.constant 0 : index
    %c0_46 = arith.constant 0 : index
    %c0_47 = arith.constant 0 : index
    %156 = vector.load %arg11[%c0_45, %c0_46, %c0_47] : memref<1x32x256xf32, #tpu.memory_space<vmem>>, vector<1x32x256xf32>
    %157 = vector.shape_cast %156 : vector<1x32x256xf32> to vector<32x256xf32>
    %158 = vector.shape_cast %155 : vector<32x256xf32> to vector<1x32x256xf32>
    tpu.vector_store %arg11[%c0_45, %c0_46, %c0_47], %158 {strides = array<i32>} : memref<1x32x256xf32, #tpu.memory_space<vmem>>, vector<1x32x256xf32>,
    return
  }
  func.func @transform_0(%arg0: i32) -> (i32, i32, i32) {
    %c0_i32 = arith.constant 0 : i32
    %c0_i32_0 = arith.constant 0 : i32
    %c0_i32_1 = arith.constant 0 : i32
    return %arg0, %c0_i32, %c0_i32_0 : i32, i32, i32
  }
  func.func @transform_1(%arg0: i32) -> (i32, i32, i32) {
    %c0_i32 = arith.constant 0 : i32
    %c0_i32_0 = arith.constant 0 : i32
    %c0_i32_1 = arith.constant 0 : i32
    return %arg0, %c0_i32, %c0_i32_0 : i32, i32, i32
  }
  func.func @transform_2(%arg0: i32) -> (i32, i32) {
    %c0_i32 = arith.constant 0 : i32
    %c0_i32_0 = arith.constant 0 : i32
    %c0_i32_1 = arith.constant 0 : i32
    return %c0_i32, %c0_i32_0 : i32, i32
  }
  func.func @transform_3(%arg0: i32) -> (i32, i32) {
    %c0_i32 = arith.constant 0 : i32
    %c0_i32_0 = arith.constant 0 : i32
    %c0_i32_1 = arith.constant 0 : i32
    return %c0_i32, %c0_i32_0 : i32, i32
  }
  func.func @transform_4(%arg0: i32) -> (i32, i32) {
    %c0_i32 = arith.constant 0 : i32
    %c0_i32_0 = arith.constant 0 : i32
    %c0_i32_1 = arith.constant 0 : i32
    return %c0_i32, %c0_i32_0 : i32, i32
  }
  func.func @transform_5(%arg0: i32) -> (i32, i32) {
    %c0_i32 = arith.constant 0 : i32
    %c0_i32_0 = arith.constant 0 : i32
    %c0_i32_1 = arith.constant 0 : i32
    return %c0_i32, %c0_i32_0 : i32, i32
  }
  func.func @transform_6(%arg0: i32) -> (i32, i32) {
    %c0_i32 = arith.constant 0 : i32
    %c0_i32_0 = arith.constant 0 : i32
    %c0_i32_1 = arith.constant 0 : i32
    return %c0_i32, %c0_i32_0 : i32, i32
  }
  func.func @transform_7(%arg0: i32) -> (i32, i32) {
    %c0_i32 = arith.constant 0 : i32
    %c0_i32_0 = arith.constant 0 : i32
    %c0_i32_1 = arith.constant 0 : i32
    return %c0_i32, %c0_i32_0 : i32, i32
  }
  func.func @transform_8(%arg0: i32) -> (i32, i32) {
    %c0_i32 = arith.constant 0 : i32
    %c0_i32_0 = arith.constant 0 : i32
    %c0_i32_1 = arith.constant 0 : i32
    return %c0_i32, %c0_i32_0 : i32, i32
  }
  func.func @transform_9(%arg0: i32) -> (i32, i32) {
    %c0_i32 = arith.constant 0 : i32
    %c0_i32_0 = arith.constant 0 : i32
    %c0_i32_1 = arith.constant 0 : i32
    return %c0_i32, %c0_i32_0 : i32, i32
  }
  func.func @transform_10(%arg0: i32) -> (i32, i32, i32) {
    %c0_i32 = arith.constant 0 : i32
    %c0_i32_0 = arith.constant 0 : i32
    %c0_i32_1 = arith.constant 0 : i32
    return %arg0, %c0_i32, %c0_i32_0 : i32, i32, i32
  }
}

</mosaic_0001>

<bundles_post_ra>
// kernel: level_fuse_forward.1
= control target key start
LH: loop header
LB: loop body
LE: loop exit
PB: predicated region body
PF: predicated region fallthrough
CT: control target
= control target key end

     0   :  { %s2617_s13 = smov 0   ;;  %s4064_s0 = inlined_call_operand.vmem [shape: f32[2,32,256], index: 0, kind: input, shape index: {}]   ;;  %s4065_s1 = inlined_call_operand.vmem [shape: f32[2,32,256], index: 1, kind: input, shape index: {}]   ;;  %s4066_s2 = inlined_call_operand.vmem [shape: f32[4,256], index: 2, kind: input, shape index: {}]   ;;  %s4067_s3 = inlined_call_operand.vmem [shape: f32[64,32], index: 3, kind: input, shape index: {}]   ;;  %s4068_s4 = inlined_call_operand.vmem [shape: f32[64,1], index: 4, kind: input, shape index: {}]   ;;  %s4069_s5 = inlined_call_operand.vmem [shape: f32[64,9], index: 5, kind: input, shape index: {}]   ;;  %s4070_s6 = inlined_call_operand.vmem [shape: f32[32,64], index: 6, kind: input, shape index: {}]   ;;  %s4071_s7 = inlined_call_operand.vmem [shape: f32[32,1], index: 7, kind: input, shape index: {}]   ;;  %s4072_s8 = inlined_call_operand.vmem [shape: f32[64,64], index: 8, kind: input, shape index: {}]   ;;  %s4073_s9 = inlined_call_operand.vmem [shape: f32[64,1], index: 9, kind: input, shape index: {}]   ;;  %s4074_s10 = inlined_call_operand.vmem [shape: f32[2,32,256], index: 10, kind: output, shape index: {}]  }
   0x1 LB: > { %s2278_s14 = sadd.s32 4294967295, %s2545_s13   ;;  %p2282_p0 = scmp.ge.s32.totalorder %s2545_s13, 1  ;;  %s2545_s13 = sphi %s2617_s13, %s20_s13  }
   0x2   : > { %p322_p1 = scmp.lt.s32.totalorder %s2545_s13, 3 }
   0x4   : > { %p323_p2 = pnand %p2282_p0, %p322_p1 }
   0x6   : > { %326 = sbr.rel (%p323_p2) target bundleno = 1100 (0x44c), region = 60 }
   0xd   : > { %v435_v0 = vld [vmem:[%s4068_s4 + $0x10] sm:$0xff]  ;;  %p365_p3 = scmp.lt.s32.totalorder %s2278_s14, 1  ;;  %v4078_v1 = vmov 0   ;;  %v4075_v2 = vmov 0.0   ;;  %v436_v3 = vld [vmem:[%s4068_s4 + $0x18] sm:$0xff]  ;;  %v2637_v4 = vld [vmem:[%s4069_s5] sm:$0xff] }
   0xe   : > { %2421 = vset.pattern.permute.xlu1 %v4078_v1  ;;  %534 = vmatprep.mubr.f32.mxu1 %v4075_v2  ;;  %v2549_v5 = vmov 7   ;;  %v1204_v6 = vld [vmem:[%s4068_s4 + $0x28] sm:$0xff]  ;;  %v2655_v7 = vld [vmem:[%s4069_s5 + $0x10] sm:$0xff]  ;;  %v1206_v21 = vld [vmem:[%s4068_s4 + $0x38] sm:$0xff]  ;;  %vm457_vm0 = vcmask 261120   ;;  %v2550_v29 = vmov 1  }
   0xf   : > { %449 = vperm.xlu1 %2421, %v435_v0   ;;  %s4288_s14 = smov (!%p365_p3, %s2278_s14), 1  ;;  %1303 = vmatprep.mubr.f32.mxu0 %v4075_v2  ;;  %v2669_v19 = vld [vmem:[%s4069_s5 + $0x28] sm:$0xff]  ;;  %v429_v22 = vld [vmem:[%s4067_s3] sm:$0xff]  ;;  %v431_v30 = vld [vmem:[%s4067_s3 + $0x10] sm:$0xff]  ;;  %v2551_v35 = vmov 2   ;;  %v2552_v37 = vmov 6  }
  0x10   : > { %2425 = vset.pattern.permute.xlu0 %v2549_v5  ;;  %s2640_s21 = sshll.u32 %s4288_s14, 6  ;;  %v433_v23 = vld [vmem:[%s4068_s4] sm:$0xff]  ;;  %v2687_v25 = vld [vmem:[%s4069_s5 + $0x8] sm:$0xff]  ;;  %v1201_v32 = vld [vmem:[%s4067_s3 + $0x30] sm:$0xff]  ;;  %v2553_v42 = vmov 8   ;;  %v4080_v43 = vmov 3  }
  0x11   : > { %948 = vperm.xlu0 %2425, %v2637_v4   ;;  %s2647_s24 = scalar_lea.vmem %s4064_s0, %s2640_s21  ;;  %v1199_v24 = vld [vmem:[%s4067_s3 + $0x20] sm:$0xff]  ;;  %v430_v26 = vld [vmem:[%s4067_s3 + $0x8] sm:$0xff]  ;;  %v432_v33 = vld [vmem:[%s4067_s3 + $0x18] sm:$0xff]  ;;  %v4077_v53 = vmov 4   ;;  %v4081_v56 = vmov 5   ;;  %s2557_s14 = smov 1  }
  0x12   : > { %v381_v8 = vld [vmem:[%s2647_s24 + $0x8] sm:$0xff]  ;;  %v383_v9 = vld [vmem:[%s2647_s24 + $0x18] sm:$0xff]  ;;  %v380_v10 = vld [vmem:[%s2647_s24] sm:$0xff]  ;;  %s2558_s15 = smov 127   ;;  %s2559_s18 = smov 16   ;;  %vm1945_vm5 = vcmask 523264  }
  0x13   : > { %454 = vperm.xlu1 %2421, %v436_v3   ;;  %v2334_v11 = vpack.c.bf16 %v383_v9, %v381_v8  ;;  %v382_v12 = vld [vmem:[%s2647_s24 + $0x10] sm:$0xff]  ;;  %v385_v13 = vld [vmem:[%s2647_s24 + $0x28] sm:$0xff]  ;;  %v387_v14 = vld [vmem:[%s2647_s24 + $0x38] sm:$0xff]  ;;  %s2560_s19 = smov 112   ;;  %s2561_s23 = smov 96  }
  0x14   : > { %v2336_v15 = vpack.c.bf16 %v382_v12, %v380_v10  ;;  %v2338_v16 = vpack.c.bf16 %v387_v14, %v385_v13  ;;  %v384_v17 = vld [vmem:[%s2647_s24 + $0x20] sm:$0xff]  ;;  %v386_v18 = vld [vmem:[%s2647_s24 + $0x30] sm:$0xff]  ;;  %v434_v27 = vld [vmem:[%s4068_s4 + $0x8] sm:$0xff]  ;;  %s374_s22 = scalar_lea.vmem %s4065_s1, %s2640_s21 }
  0x15   : > { %956 = vperm.xlu0 %2425, %v2655_v7   ;;  %2335 = vmatprep.subr.bf16.mxu1 %v2334_v11  ;;  %v2340_v20 = vpack.c.bf16 %v386_v18, %v384_v17  ;;  %v1200_v28 = vld [vmem:[%s4067_s3 + $0x28] sm:$0xff]  ;;  %v1203_v31 = vld [vmem:[%s4068_s4 + $0x20] sm:$0xff]  ;;  %v1205_v34 = vld [vmem:[%s4068_s4 + $0x30] sm:$0xff] }
  0x16   : > { %2351 = vmatprep.subr.bf16.mxu0 %v2334_v11  ;;  %2337 = vmatpush1.bf16.msra.mxu1 %v2336_v15  ;;  %v1202_v36 = vld [vmem:[%s4067_s3 + $0x38] sm:$0xff]  ;;  %v2751_v39 = vld [vmem:[%s4069_s5 + $0x20] sm:$0xff]  ;;  %v2759_v40 = vld [vmem:[%s4069_s5 + $0x30] sm:$0xff] }
  0x17   : > { %1214 = vperm.xlu1 %2421, %v1204_v6   ;;  %2353 = vmatpush1.bf16.msra.mxu0 %v2336_v15  ;;  %v2744_v38 = vld [vmem:[%s4069_s5 + $0x18] sm:$0xff] }
  0x18   : > { %2339 = vmatprep.subr.bf16.mxu1 %v2338_v16  ;;  %2355 = vmatprep.subr.bf16.mxu0 %v2338_v16  ;;  %v2772_v41 = vld [vmem:[%s4069_s5 + $0x38] sm:$0xff] }
  0x19   : > { %1661 = vperm.xlu0 %2425, %v2669_v19  }
  0x1a   : > { %2341 = vmatpush1.bf16.msra.mxu1 %v2340_v20 }
  0x1b   : > { %1224 = vperm.xlu1 %2421, %v1206_v21   ;;  %2357 = vmatpush1.bf16.msra.mxu0 %v2340_v20 }
  0x1d   : > { %2439 = vset.pattern.permute.xlu0 %v4078_v1  ;;  %2289 = vmatmul.mubr.msk.f32.vlgmr.msra.gmra.mrb[0].mxu1 %vm457_vm0, %v429_v22 }
  0x1e   : > { %439 = vperm.xlu0 %2439, %v433_v23   ;;  %2297 = vmatmul.mubr.msk.f32.vlgmr.msra.gmra.mrb[0].mxu0 %vm457_vm0, %v1199_v24 }
  0x1f   : > { %781 = vperm.xlu1 %2421, %v2687_v25   ;;  %540 = vmatprep.mubr.f32.mxu1 %v4075_v2 }
  0x20   : > { %1309 = vmatprep.mubr.f32.mxu0 %v4075_v2 }
  0x21   : > { %2290 = vmatmul.mubr.msk.f32.gmra.mrb[2].mxu1 %vm457_vm0, %v430_v26 }
  0x22   : > { %444 = vperm.xlu0 %2439, %v434_v27   ;;  %2298 = vmatmul.mubr.msk.f32.gmra.mrb[2].mxu0 %vm457_vm0, %v1200_v28 }
  0x23   : > { %2422 = vset.pattern.permute.xlu1 %v2550_v29  ;;  %546 = vmatprep.mubr.f32.mxu1 %v4075_v2 }
  0x24   : > { %805 = vperm.xlu1 %2422, %v2687_v25   ;;  %1315 = vmatprep.mubr.f32.mxu0 %v4075_v2 }
  0x25   : > { %2291 = vmatmul.mubr.msk.f32.gmra.mrb[4].mxu1 %vm457_vm0, %v431_v30 }
  0x26   : > { %1209 = vperm.xlu0 %2439, %v1203_v31   ;;  %2299 = vmatmul.mubr.msk.f32.gmra.mrb[4].mxu0 %vm457_vm0, %v1201_v32 }
  0x27   : > { %552 = vmatprep.mubr.f32.mxu1 %v4075_v2  ;;  %1321 = vmatprep.mubr.f32.mxu0 %v4075_v2 }
  0x28   : > { %2423 = vset.pattern.permute.xlu1 %v2551_v35 }
  0x29   : > { %833 = vperm.xlu1 %2423, %v2637_v4   ;;  %2292 = vmatmul.mubr.msk.f32.gmra.mrb[6].mxu1 %vm457_vm0, %v432_v33 }
  0x2a   : > { %1219 = vperm.xlu0 %2439, %v1205_v34   ;;  %2300 = vmatmul.mubr.msk.f32.gmra.mrb[6].mxu0 %vm457_vm0, %v1202_v36 }
  0x2b   : > { %1166 = vmatprep.mubr.f32.mxu1 %v4075_v2  ;;  %2034 = vmatprep.mubr.f32.mxu0 %v4075_v2 }
  0x2d   : > { %2424 = vset.pattern.permute.xlu1 %v2552_v37 }
  0x2e   : > { %924 = vperm.xlu1 %2424, %v2637_v4   ;;  %777 = vperm.xlu0 %2439, %v2637_v4  }
  0x32   : > { %928 = vperm.xlu1 %2424, %v2687_v25   ;;  %789 = vperm.xlu0 %2439, %v2744_v38  }
  0x36   : > { %2426 = vset.pattern.permute.xlu1 %v2549_v5  ;;  %1505 = vperm.xlu0 %2439, %v2751_v39  }
  0x37   : > { %952 = vperm.xlu1 %2426, %v2687_v25  }
  0x3a   : > { %1513 = vperm.xlu0 %2439, %v2759_v40  }
  0x3b   : > { %2427 = vset.pattern.permute.xlu1 %v4078_v1 }
  0x3c   : > { %785 = vperm.xlu1 %2427, %v2655_v7  }
  0x3e   : > { %2440 = vset.pattern.permute.xlu0 %v2550_v29 }
  0x3f   : > { %801 = vperm.xlu0 %2440, %v2637_v4  }
  0x40   : > { %2428 = vset.pattern.permute.xlu1 %v2550_v29 }
  0x41   : > { %809 = vperm.xlu1 %2428, %v2655_v7  }
  0x43   : > { %1533 = vperm.xlu0 %2440, %v2669_v19  }
  0x45   : > { %813 = vperm.xlu1 %2428, %v2744_v38  }
  0x47   : > { %1541 = vperm.xlu0 %2440, %v2772_v41  }
  0x49   : > { %2429 = vset.pattern.permute.xlu1 %v2553_v42 }
  0x4a   : > { %984 = vperm.xlu1 %2429, %v2687_v25  }
  0x4b   : > { %2443 = vset.pattern.permute.xlu0 %v2551_v35 }
  0x4c   : > { %837 = vperm.xlu0 %2443, %v2687_v25  }
  0x4e   : > { %2430 = vset.pattern.permute.xlu1 %v2551_v35 }
  0x4f   : > { %841 = vperm.xlu1 %2430, %v2655_v7  }
  0x50   : > { %845 = vperm.xlu0 %2443, %v2744_v38  }
  0x53   : > { %2431 = vset.pattern.permute.xlu1 %v2552_v37 }
  0x54   : > { %932 = vperm.xlu1 %2431, %v2655_v7   ;;  %1569 = vperm.xlu0 %2443, %v2759_v40  }
  0x58   : > { %936 = vperm.xlu1 %2431, %v2744_v38   ;;  %2445 = vset.pattern.permute.xlu0 %v2552_v37 }
  0x59   : > { %1633 = vperm.xlu0 %2445, %v2751_v39  }
  0x5c   : > { %2432 = vset.pattern.permute.xlu1 %v2549_v5 }
  0x5d   : > { %960 = vperm.xlu1 %2432, %v2744_v38   ;;  %1645 = vperm.xlu0 %2445, %v2772_v41  }
  0x61   : > { %2433 = vset.pattern.permute.xlu1 %v2553_v42  ;;  %2448 = vset.pattern.permute.xlu0 %v2553_v42 }
  0x62   : > { %988 = vperm.xlu1 %2433, %v2655_v7   ;;  %980 = vperm.xlu0 %2448, %v2637_v4  }
  0x66   : > { %2434 = vset.pattern.permute.xlu1 %v4078_v1  ;;  %992 = vperm.xlu0 %2448, %v2744_v38  }
  0x67   : > { %1509 = vperm.xlu1 %2434, %v2669_v19  }
  0x6a   : > { %1697 = vperm.xlu0 %2448, %v2759_v40  }
  0x6b   : > { %2435 = vset.pattern.permute.xlu1 %v2550_v29 }
  0x6c   : > { %1529 = vperm.xlu1 %2435, %v2751_v39  }
  0x6e   : > { %2452 = vset.pattern.permute.xlu0 %v4080_v43 }
  0x6f   : > { %691 = vperm.xlu0 %2452, %v2687_v25  }
  0x70   : > { %2436 = vset.pattern.permute.xlu1 %v2551_v35 }
  0x71   : > { %1561 = vperm.xlu1 %2436, %v2751_v39  }
  0x73   : > { %701 = vperm.xlu0 %2452, %v2744_v38  }
  0x75   : > { %1565 = vperm.xlu1 %2436, %v2669_v19  }
  0x77   : > { %1419 = vperm.xlu0 %2452, %v2669_v19  }
  0x79   : > { %2437 = vset.pattern.permute.xlu1 %v2552_v37 }
  0x7a   : > { %1637 = vperm.xlu1 %2437, %v2669_v19  }
  0x7e   : > { %2438 = vset.pattern.permute.xlu1 %v2549_v5 }
  0x7f   : > { %1657 = vperm.xlu1 %2438, %v2751_v39  }
  0x83   : > { %2441 = vset.pattern.permute.xlu1 %v4078_v1 }
  0x84   : > { %1517 = vperm.xlu1 %2441, %v2772_v41  }
  0x88   : > { %2442 = vset.pattern.permute.xlu1 %v2550_v29 }
  0x89   : > { %1537 = vperm.xlu1 %2442, %v2759_v40  }
  0x8d   : > { %2444 = vset.pattern.permute.xlu1 %v2553_v42 }
  0x8e   : > { %1689 = vperm.xlu1 %2444, %v2751_v39   ;;  %v2815_v44 = vpop.permute.xlu1 %449 }
  0x90   : > { %v2868_v61 = vpop.permute.xlu0 %948 }
  0x92   : > { %1693 = vperm.xlu1 %2444, %v2669_v19   ;;  %v2818_v45 = vpop.permute.xlu1 %454 }
  0x94   : > { %v2876_v0 = vpop.permute.xlu0 %956 }
  0x95   : > { %4155 = vst [vmem:[#allocation7_spill] sm:$0xff] %v2876_v0 }
  0x96   : > { %2446 = vset.pattern.permute.xlu1 %v2551_v35  ;;  %v2821_v46 = vpop.permute.xlu1 %1214 }
  0x97   : > { %1573 = vperm.xlu1 %2446, %v2772_v41  }
  0x9a   : > { %v2824_v47 = vpop.permute.xlu1 %1224 }
  0x9b   : > { %2447 = vset.pattern.permute.xlu1 %v2552_v37 }
  0x9c   : > { %1641 = vperm.xlu1 %2447, %v2759_v40  }
  0x9e   : > { %v2828_v48 = vpop.permute.xlu1 %781 }
  0xa0   : > { %2449 = vset.pattern.permute.xlu1 %v2549_v5  ;;  %v2883_v5 = vpop.permute.xlu0 %1661 }
  0xa1   : > { %1665 = vperm.xlu1 %2449, %v2759_v40  }
  0xa3   : > { %v2832_v49 = vpop.permute.xlu1 %805 }
  0xa4   : > { %v440_v8 = vpop.permute.xlu0 %439 }
  0xa5   : > { %1669 = vperm.xlu1 %2449, %v2772_v41  }
  0xa8   : > { %v2835_v50 = vpop.permute.xlu1 %833  ;;  %v445_v10 = vpop.permute.xlu0 %444 }
  0xa9   : > { %2450 = vset.pattern.permute.xlu1 %v2553_v42 }
  0xaa   : > { %1701 = vperm.xlu1 %2450, %v2772_v41  }
  0xac   : > { %v1210_v13 = vpop.permute.xlu0 %1209 }
  0xad   : > { %v2838_v51 = vpop.permute.xlu1 %924 }
  0xae   : > { %2451 = vset.pattern.permute.xlu1 %v4080_v43 }
  0xaf   : > { %686 = vperm.xlu1 %2451, %v2637_v4  }
  0xb1   : > { %v2842_v52 = vpop.permute.xlu1 %928 }
  0xb3   : > { %2453 = vset.pattern.permute.xlu1 %v4077_v53 }
  0xb4   : > { %713 = vperm.xlu1 %2453, %v2637_v4  }
  0xb6   : > { %v2846_v54 = vpop.permute.xlu1 %952 }
  0xb8   : > { %717 = vperm.xlu1 %2453, %v2687_v25  }
  0xbb   : > { %v2849_v55 = vpop.permute.xlu1 %785 }
  0xbc   : > { %4150 = vst [vmem:[#allocation2_spill] sm:$0xff] %v2849_v55  ;;  %2454 = vset.pattern.permute.xlu1 %v4081_v56 }
  0xbd   : > { %749 = vperm.xlu1 %2454, %v2687_v25  }
  0xc0   : > { %v2853_v57 = vpop.permute.xlu1 %809 }
  0xc1   : > { %4151 = vst [vmem:[#allocation3_spill] sm:$0xff] %v2853_v57  ;;  %2455 = vset.pattern.permute.xlu1 %v4080_v43 }
  0xc2   : > { %696 = vperm.xlu1 %2455, %v2655_v7  }
  0xc4   : > { %v2857_v58 = vpop.permute.xlu1 %813 }
  0xc6   : > { %2456 = vset.pattern.permute.xlu1 %v4077_v53 }
  0xc7   : > { %721 = vperm.xlu1 %2456, %v2655_v7  }
  0xc9   : > { %v2861_v59 = vpop.permute.xlu1 %984 }
  0xcb   : > { %725 = vperm.xlu1 %2456, %v2744_v38  }
  0xce   : > { %v2864_v60 = vpop.permute.xlu1 %841 }
  0xcf   : > { %4152 = vst [vmem:[#allocation4_spill] sm:$0xff] %v2864_v60  ;;  %2457 = vset.pattern.permute.xlu1 %v4081_v56 }
  0xd0   : > { %757 = vperm.xlu1 %2457, %v2744_v38  }
  0xd3   : > { %v2870_v62 = vpop.permute.xlu1 %932 }
  0xd4   : > { %4153 = vst [vmem:[#allocation5_spill] sm:$0xff] %v2870_v62  ;;  %2458 = vset.pattern.permute.xlu1 %v4080_v43  ;;  %v4187_v62 = vmov 3  }
  0xd5   : > { %1414 = vperm.xlu1 %2458, %v2751_v39  }
  0xd7   : > { %v2874_v63 = vpop.permute.xlu1 %936 }
  0xd8   : > { %4154 = vst [vmem:[#allocation6_spill] sm:$0xff] %v2874_v63 }
  0xd9   : > { %2459 = vset.pattern.permute.xlu1 %v4077_v53 }
  0xda   : > { %1441 = vperm.xlu1 %2459, %v2751_v39  }
  0xdc   : > { %v2880_v3 = vpop.permute.xlu1 %960 }
  0xdd   : > { %4156 = vst [vmem:[#allocation8_spill] sm:$0xff] %v2880_v3 }
  0xde   : > { %1445 = vperm.xlu1 %2459, %v2669_v19  }
  0xe1   : > { %v2885_v6 = vpop.permute.xlu1 %988 }
  0xe2   : > { %4157 = vst [vmem:[#allocation9_spill] sm:$0xff] %v2885_v6  ;;  %2460 = vset.pattern.permute.xlu1 %v4081_v56 }
  0xe6   : > { %v2888_v9 = vpop.permute.xlu1 %1509 }
  0xe7   : > { %4158 = vst [vmem:[#allocation10_spill] sm:$0xff] %v2888_v9 }
  0xeb   : > { %v2890_v11 = vpop.permute.xlu1 %1529 }
  0xf0   : > { %v2892_v12 = vpop.permute.xlu1 %1561  ;;  %v536_v14 = vpop.f32.mrb[0].mxu1 }
  0xf1   : > { %v537_v15 = vadd.f32 %v536_v14, %v440_v8  ;;  %v1305_v16 = vpop.f32.mrb[0].mxu0  ;;  %v538_v17 = vpop.f32.mrb[1].mxu1 }
  0xf2   : > { %v1306_v18 = vadd.f32 %v1305_v16, %v1210_v13  ;;  %v1307_v20 = vpop.f32.mrb[1].mxu0  ;;  %v539_v34 = vadd.f32 %v538_v17, %v440_v8  ;;  %v1220_v17 = vpop.permute.xlu0 %1219 }
  0xf3   : > { %v559_v21 = vmax.f32 %v537_v15, 0.0  ;;  %v1308_v22 = vadd.f32 %v1307_v20, %v1210_v13 }
  0xf4   : > { %v2894_v23 = vpop.permute.xlu1 %1565  ;;  %v1328_v24 = vmax.f32 %v1306_v18, 0.0  ;;  %v542_v25 = vpop.f32.mrb[2].mxu1  ;;  %v560_v14 = vmax.f32 %v539_v34, 0.0 }
  0xf5   : > { %4159 = vst [vmem:[#allocation11_spill] sm:$0xff] %v2894_v23  ;;  %v2896_v26 = vmin.f32 %v559_v21, 6.0  ;;  %v1311_v27 = vpop.f32.mrb[2].mxu0  ;;  %v544_v28 = vpop.f32.mrb[3].mxu1  ;;  %v1329_v30 = vmax.f32 %v1308_v22, 0.0  ;;  %v543_v38 = vadd.f32 %v542_v25, %v445_v10 }
  0xf6   : > { %v2898_v29 = vmin.f32 %v1328_v24, 6.0  ;;  %v1313_v31 = vpop.f32.mrb[3].mxu0  ;;  %v2920_v21 = vmin.f32 %v560_v14, 6.0  ;;  %v1312_v22 = vadd.f32 %v1311_v27, %v2821_v46  ;;  %v545_v25 = vadd.f32 %v544_v28, %v445_v10 }
  0xf7   : > { %579 = vrot.lane.b32.xlu1 %v2896_v26, %s2557_s14  ;;  %v2906_v37 = vmin.f32 %v1329_v30, 6.0  ;;  %v561_v18 = vmax.f32 %v543_v38, 0.0  ;;  %v2931_v38 = vpop.permute.xlu0 %777  ;;  %v1314_v27 = vadd.f32 %v1313_v31, %v2821_v46 }
  0xf8   : > { %4160 = vst [vmem:[#allocation12_spill] sm:$0xff] %v2898_v29  ;;  %1380 = vrot.lane.b32.xlu0 %v2898_v29, %s2558_s15  ;;  %v548_v32 = vpop.f32.mrb[4].mxu1  ;;  %v1330_v34 = vmax.f32 %v1312_v22, 0.0  ;;  %v562_v2 = vmax.f32 %v545_v25, 0.0  ;;  %v3144_v57 = vmul.f32 %v2890_v11, %v2898_v29 }
  0xf9   : > { %v2904_v33 = vpop.permute.xlu1 %1637  ;;  %v1317_v35 = vpop.f32.mrb[4].mxu0  ;;  %4162 = vst [vmem:[#allocation14_spill] sm:$0xff] %v2906_v37  ;;  %v2923_v24 = vmin.f32 %v561_v18, 6.0  ;;  %v1331_v53 = vmax.f32 %v1314_v27, 0.0  ;;  %v549_v31 = vadd.f32 %v548_v32, %v2815_v44 }
  0xfa   : > { %4161 = vst [vmem:[#allocation13_spill] sm:$0xff] %v2904_v33  ;;  %v550_v36 = vpop.f32.mrb[5].mxu1  ;;  %v1319_v42 = vpop.f32.mrb[5].mxu0  ;;  %v2939_v10 = vmin.f32 %v1330_v34, 6.0  ;;  %v2942_v28 = vmin.f32 %v562_v2, 6.0  ;;  %v1318_v18 = vadd.f32 %v1317_v35, %v1220_v17 }
  0xfb   : > { %633 = vrot.lane.b32.xlu1 %v2896_v26, %s2558_s15  ;;  %v2946_v22 = vpop.permute.xlu0 %789  ;;  %v551_v34 = vadd.f32 %v550_v36, %v2815_v44  ;;  %v2959_v46 = vmin.f32 %v1331_v53, 6.0  ;;  %v563_v36 = vmax.f32 %v549_v31, 0.0 }
  0xfc   : > { %1356 = vrot.lane.b32.xlu0 %v2906_v37, %s2557_s14  ;;  %v554_v13 = vpop.f32.mrb[6].mxu1  ;;  %4165 = vst [vmem:[#allocation17_spill] sm:$0xff] %v2946_v22  ;;  %v1332_v1 = vmax.f32 %v1318_v18, 0.0  ;;  %v1320_v18 = vadd.f32 %v1319_v42, %v1220_v17  ;;  %v4181_v22 = vmov 5  }
  0xfd   : > { %v1323_v15 = vpop.f32.mrb[6].mxu0  ;;  %v556_v20 = vpop.f32.mrb[7].mxu1  ;;  %v564_v27 = vmax.f32 %v551_v34, 0.0  ;;  %v555_v44 = vadd.f32 %v554_v13, %v2818_v45  ;;  %v2981_v32 = vmin.f32 %v563_v36, 6.0 }
  0xfe   : > { %v2912_v16 = vpop.permute.xlu1 %1657  ;;  %v2914_v8 = vpop.f32.mrb[7].mxu0  ;;  %v2964_v43 = vmin.f32 %v1332_v1, 6.0  ;;  %v1333_v53 = vmax.f32 %v1320_v18, 0.0  ;;  %v1324_v34 = vadd.f32 %v1323_v15, %v2824_v47  ;;  %v557_v36 = vadd.f32 %v556_v20, %v2818_v45 }
  0xff   : > { %1348 = vrot.lane.b32.xlu1 %v2898_v29, %s2557_s14  ;;  %v2962_v35 = vpop.permute.xlu0 %1505  ;;  %4172 = vst [vmem:[#allocation24_spill] sm:$0xff] %v2981_v32  ;;  %v565_v17 = vmax.f32 %v555_v44, 0.0  ;;  %v3181_v3 = vmul.f32 %v2912_v16, %v2906_v37 }
 0x100   : > { %1388 = vrot.lane.b32.xlu0 %v2906_v37, %s2558_s15  ;;  %4168 = vst [vmem:[#allocation20_spill] sm:$0xff] %v2964_v43  ;;  %v2983_v42 = vmin.f32 %v1333_v53, 6.0  ;;  %v1334_v18 = vmax.f32 %v1324_v34, 0.0 }
 0x101   : > { %4202 = vst [vmem:[#allocation50_spill] sm:$0xff] %v3181_v3 }
 0x102   : > { %4173 = vst [vmem:[#allocation25_spill] sm:$0xff] %v2983_v42  ;;  %v3005_v44 = vmin.f32 %v1334_v18, 6.0 }
 0x103   : > { %v2925_v30 = vpop.permute.xlu1 %1517  ;;  %587 = vrot.lane.b32.xlu1 %v2920_v21, %s2557_s14  ;;  %v2977_v1 = vpop.permute.xlu0 %1513 }
 0x104   : > { %4163 = vst [vmem:[#allocation15_spill] sm:$0xff] %v2925_v30  ;;  %581 = vrot.lane.b32.xlu0 %v2923_v24, %s2557_s14  ;;  %v2972_v30 = vmin.f32 %v564_v27, 6.0  ;;  %4171 = vst [vmem:[#allocation23_spill] sm:$0xff] %v2977_v1  ;;  %v2994_v27 = vmin.f32 %v565_v17, 6.0  ;;  %v4189_v1 = vmov 4  }
 0x105   : > { %4176 = vst [vmem:[#allocation28_spill] sm:$0xff] %v3005_v44 }
 0x106   : > { %4170 = vst [vmem:[#allocation22_spill] sm:$0xff] %v2972_v30 }
 0x107   : > { %641 = vrot.lane.b32.xlu1 %v2920_v21, %s2558_s15  ;;  %v2990_v13 = vpop.permute.xlu0 %801 }
 0x108   : > { %v2935_v14 = vpop.permute.xlu1 %1537  ;;  %635 = vrot.lane.b32.xlu0 %v2923_v24, %s2558_s15 }
 0x109   : > { %4164 = vst [vmem:[#allocation16_spill] sm:$0xff] %v2935_v14 }
 0x10b   : > { %1350 = vrot.lane.b32.xlu1 %v2939_v10, %s2557_s14  ;;  %v3003_v15 = vpop.permute.xlu0 %1533 }
 0x10c   : > { %589 = vrot.lane.b32.xlu0 %v2942_v28, %s2557_s14 }
 0x10d   : > { %v2950_v25 = vpop.permute.xlu1 %1689 }
 0x10e   : > { %4166 = vst [vmem:[#allocation18_spill] sm:$0xff] %v2950_v25 }
 0x10f   : > { %1382 = vrot.lane.b32.xlu1 %v2939_v10, %s2558_s15  ;;  %v3015_v20 = vpop.permute.xlu0 %1541 }
 0x110   : > { %643 = vrot.lane.b32.xlu0 %v2942_v28, %s2558_s15  ;;  %4179 = vst [vmem:[#allocation31_spill] sm:$0xff] %v3015_v20 }
 0x111   : > { %v2957_v2 = vpop.permute.xlu1 %1693 }
 0x112   : > { %4167 = vst [vmem:[#allocation19_spill] sm:$0xff] %v2957_v2 }
 0x113   : > { %1358 = vrot.lane.b32.xlu1 %v2959_v46, %s2557_s14  ;;  %v3023_v18 = vpop.permute.xlu0 %837 }
 0x114   : > { %1352 = vrot.lane.b32.xlu0 %v2964_v43, %s2557_s14 }
 0x116   : > { %v2970_v56 = vpop.permute.xlu1 %1573 }
 0x117   : > { %4169 = vst [vmem:[#allocation21_spill] sm:$0xff] %v2970_v56  ;;  %1390 = vrot.lane.b32.xlu1 %v2959_v46, %s2558_s15  ;;  %v566_v56 = vmax.f32 %v557_v36, 0.0  ;;  %v1326_v36 = vadd.f32 %v2914_v8, %v2824_v47  ;;  %v3035_v6 = vpop.permute.xlu0 %845 }
 0x118   : > { %645 = vrot.lane.b32.xlu0 %v2972_v30, %s2558_s15  ;;  %4182 = vst [vmem:[#allocation33_spill] sm:$0xff] %v3035_v6 }
 0x119   : > { %v3013_v45 = vmin.f32 %v566_v56, 6.0  ;;  %v1335_v63 = vmax.f32 %v1326_v36, 0.0 }
 0x11b   : > { %v2986_v31 = vpop.permute.xlu1 %1641  ;;  %583 = vrot.lane.b32.xlu1 %v2981_v32, %s2557_s14  ;;  %4178 = vst [vmem:[#allocation30_spill] sm:$0xff] %v3013_v45  ;;  %v3046_v8 = vpop.permute.xlu0 %1569 }
 0x11c   : > { %4174 = vst [vmem:[#allocation26_spill] sm:$0xff] %v2986_v31  ;;  %1360 = vrot.lane.b32.xlu0 %v2983_v42, %s2557_s14  ;;  %4184 = vst [vmem:[#allocation35_spill] sm:$0xff] %v3046_v8 }
 0x11f   : > { %637 = vrot.lane.b32.xlu1 %v2981_v32, %s2558_s15 }
 0x120   : > { %v2997_v53 = vpop.permute.xlu1 %1665  ;;  %585 = vrot.lane.b32.xlu0 %v2994_v27, %s2557_s14 }
 0x121   : > { %4175 = vst [vmem:[#allocation27_spill] sm:$0xff] %v2997_v53 }
 0x123   : > { %1384 = vrot.lane.b32.xlu1 %v2964_v43, %s2558_s15 }
 0x124   : > { %v3009_v17 = vpop.permute.xlu1 %1669  ;;  %1386 = vrot.lane.b32.xlu0 %v3005_v44, %s2558_s15 }
 0x125   : > { %4177 = vst [vmem:[#allocation29_spill] sm:$0xff] %v3009_v17 }
 0x127   : > { %591 = vrot.lane.b32.xlu1 %v2972_v30, %s2557_s14 }
 0x128   : > { %593 = vrot.lane.b32.xlu0 %v3013_v45, %s2557_s14 }
 0x129   : > { %v3021_v34 = vpop.permute.xlu1 %1701 }
 0x12a   : > { %4180 = vst [vmem:[#allocation32_spill] sm:$0xff] %v3021_v34  ;;  %v3038_v34 = vmin.f32 %v1335_v63, 6.0 }
 0x12b   : > { %1392 = vrot.lane.b32.xlu1 %v2983_v42, %s2558_s15 }
 0x12c   : > { %1429 = vperm.xlu0 %2452, %v2772_v41   ;;  %4183 = vst [vmem:[#allocation34_spill] sm:$0xff] %v3038_v34 }
 0x12e   : > { %v3030_v56 = vpop.permute.xlu1 %686 }
 0x12f   : > { %639 = vrot.lane.b32.xlu1 %v2994_v27, %s2558_s15 }
 0x130   : > { %2462 = vset.pattern.permute.xlu0 %v4181_v22 }
 0x131   : > { %745 = vperm.xlu0 %2462, %v2637_v4   ;;  %v3053_v4 = vpop.permute.xlu0 %1633 }
 0x133   : > { %v3040_v47 = vpop.permute.xlu1 %713  ;;  %1354 = vrot.lane.b32.xlu1 %v3005_v44, %s2557_s14 }
 0x135   : > { %1394 = vrot.lane.b32.xlu0 %v3038_v34, %s2558_s15  ;;  %v3061_v6 = vpop.permute.xlu0 %1645 }
 0x136   : > { %4185 = vst [vmem:[#allocation36_spill] sm:$0xff] %v3061_v6 }
 0x137   : > { %647 = vrot.lane.b32.xlu1 %v3013_v45, %s2558_s15  ;;  %v3050_v36 = vpop.permute.xlu1 %717 }
 0x139   : > { %753 = vperm.xlu0 %2462, %v2655_v7   ;;  %v4188_v7 = vmov 0   ;;  %v3069_v31 = vpop.permute.xlu0 %980 }
 0x13b   : > { %1362 = vrot.lane.b32.xlu1 %v3038_v34, %s2557_s14 }
 0x13c   : > { %v3058_v63 = vpop.permute.xlu1 %749 }
 0x13d   : > { %1473 = vperm.xlu0 %2462, %v2751_v39  }
 0x13f   : > { %1477 = vperm.xlu1 %2460, %v2669_v19   ;;  %v3075_v19 = vpop.permute.xlu0 %992 }
 0x140   : > { %4191 = vst [vmem:[#allocation39_spill] sm:$0xff] %v3075_v19 }
 0x141   : > { %1481 = vperm.xlu0 %2462, %v2759_v40   ;;  %v3064_v8 = vpop.permute.xlu1 %696 }
 0x142   : > { %4186 = vst [vmem:[#allocation37_spill] sm:$0xff] %v3064_v8 }
 0x143   : > { %2461 = vset.pattern.permute.xlu1 %v4187_v62  ;;  %v3082_v62 = vpop.permute.xlu0 %1697 }
 0x144   : > { %1424 = vperm.xlu1 %2461, %v2759_v40   ;;  %4193 = vst [vmem:[#allocation41_spill] sm:$0xff] %v3082_v62 }
 0x145   : > { %2466 = vset.pattern.permute.xlu0 %v4188_v7 }
 0x146   : > { %v3072_v39 = vpop.permute.xlu1 %721 }
 0x147   : > { %4190 = vst [vmem:[#allocation38_spill] sm:$0xff] %v3072_v39 }
 0x148   : > { %2463 = vset.pattern.permute.xlu1 %v4189_v1  ;;  %v3087_v1 = vpop.permute.xlu0 %691 }
 0x149   : > { %1449 = vperm.xlu1 %2463, %v2759_v40  }
 0x14a   : > { %v3078_v6 = vpop.permute.xlu1 %725 }
 0x14b   : > { %4192 = vst [vmem:[#allocation40_spill] sm:$0xff] %v3078_v6 }
 0x14c   : > { %v3091_v40 = vpop.permute.xlu0 %701 }
 0x14d   : > { %1453 = vperm.xlu1 %2463, %v2772_v41   ;;  %4196 = vst [vmem:[#allocation44_spill] sm:$0xff] %v3091_v40 }
 0x14f   : > { %v3084_v8 = vpop.permute.xlu1 %757 }
 0x150   : > { %4194 = vst [vmem:[#allocation42_spill] sm:$0xff] %v3084_v8  ;;  %v3095_v60 = vpop.permute.xlu0 %1419 }
 0x151   : > { %2464 = vset.pattern.permute.xlu1 %v4181_v22  ;;  %v595_v22 = vlaneseq }
 0x152   : > { %1485 = vperm.xlu1 %2464, %v2772_v41  }
 0x153   : > { %v3101_v62 = vshrl.u32 %v595_v22, 7  ;;  %v3116_v33 = vand.u32 127, %v595_v22 }
 0x154   : > { %v3089_v39 = vpop.permute.xlu1 %1414 }
 0x155   : > { %4195 = vst [vmem:[#allocation43_spill] sm:$0xff] %v3089_v39  ;;  %4198 = vst [vmem:[#allocation46_spill] sm:$0xff] %v3101_v62  ;;  %v609_v53 = vsub.s32 0, %v3101_v62  ;;  %v613_v39 = vsub.s32 4, %v3101_v62  ;;  %v660_v40 = vsub.s32 1, %v3101_v62  ;;  %v664_v55 = vsub.s32 5, %v3101_v62 }
 0x156   : > { %2465 = vset.pattern.permute.xlu1 %v4188_v7  ;;  %vm597_vm1 = vcmp.lt.s32.totalorder %v3116_v33, 1  ;;  %vm649_vm2 = vcmp.lt.s32.totalorder %v3116_v33, 127  ;;  %vm880_vm3 = vcmp.lt.s32.totalorder %v3116_v33, 16  ;;  %vm1027_vm4 = vcmp.lt.s32.totalorder %v3116_v33, 112 }
 0x159   : > { %v3093_v19 = vpop.permute.xlu1 %1441 }
 0x15a   : > { %4197 = vst [vmem:[#allocation45_spill] sm:$0xff] %v3093_v19  ;;  %v3110_v19 = vld [vmem:[%s4066_s2] sm:$0xff] }
 0x15b   : > { %4199 = vst [vmem:[#allocation47_spill] sm:$0xff] %v3110_v19  ;;  %v610_v14 = vrot.slane %v3110_v19, %v609_v53  ;;  %v614_v43 = vrot.slane %v3110_v19, %v613_v39  ;;  %v661_v34 = vrot.slane %v3110_v19, %v660_v40  ;;  %v665_v0 = vrot.slane %v3110_v19, %v664_v55 }
 0x15c   : > { %v816_v55 = vmul.f32 %v2990_v13, %v2896_v26 }
 0x15d   : > { %v3097_v6 = vpop.permute.xlu1 %1445  ;;  %v3123_v23 = vrot.slane %v610_v14, %v609_v53  ;;  %v3125_v62 = vrot.slane %v614_v43, %v609_v53  ;;  %v3128_v22 = vrot.slane %v661_v34, %v660_v40  ;;  %v3136_v19 = vrot.slane %v665_v0, %v660_v40 }
 0x15e   : > { %v817_v34 = vmul.f32 %v2990_v13, %v2920_v21  ;;  %v3152_v40 = vmul.f32 %v3003_v15, %v2939_v10  ;;  %v3160_v13 = vmul.f32 %v2868_v61, %v2920_v21 }
 0x160   : > { %4200 = vst [vmem:[#allocation48_spill] sm:$0xff] %v3152_v40 }
 0x169   : > { %v580_v41 = vpop.permute.xlu1 %579 }
 0x16a   : > { %v3099_v17 = vpop.permute.xlu0 %1380 }
 0x16d   : > { %v634_v8 = vpop.permute.xlu1 %633 }
 0x16e   : > { %v3103_v7 = vpop.permute.xlu0 %1356 }
 0x171   : > { %v1349_v2 = vpop.permute.xlu1 %1348 }
 0x172   : > { %v3114_v42 = vpop.permute.xlu0 %1388 }
 0x175   : > { %v588_v45 = vpop.permute.xlu1 %587 }
 0x176   : > { %v582_v30 = vpop.permute.xlu0 %581  ;;  %v598_v25 = vsel %vm597_vm1, %v580_v41, %v588_v45  ;;  %v602_v39 = vsel %vm597_vm1, %v588_v45, %v580_v41 }
 0x177   : > { %v625_v14 = vmul.f32 %v3123_v23, %v602_v39  ;;  %v626_v43 = vmul.f32 %v3125_v62, %v598_v25  ;;  %v3156_v25 = vmul.f32 %v2890_v11, %v2906_v37  ;;  %v3165_v39 = vmul.f32 %v3003_v15, %v2959_v46 }
 0x178   : > { %v3177_v11 = vmul.f32 %v2912_v16, %v2898_v29  ;;  %v3190_v29 = vmul.f32 %v2883_v5, %v2939_v10  ;;  %v728_v16 = vmul.f32 %v3040_v47, %v2896_v26  ;;  %v729_v37 = vmul.f32 %v3040_v47, %v2920_v21 }
 0x179   : > { %v642_v53 = vpop.permute.xlu1 %641  ;;  %v792_v41 = vmul.f32 %v2931_v38, %v625_v14  ;;  %4201 = vst [vmem:[#allocation49_spill] sm:$0xff] %v3165_v39  ;;  %v704_v15 = vmul.f32 %v3030_v56, %v625_v14  ;;  %v705_v39 = vmul.f32 %v3030_v56, %v626_v43 }
 0x17a   : > { %v636_v32 = vpop.permute.xlu0 %635  ;;  %v650_v45 = vsel %vm649_vm2, %v634_v8, %v642_v53  ;;  %v654_v0 = vsel %vm649_vm2, %v642_v53, %v634_v8  ;;  %v963_v8 = vmul.f32 %v2868_v61, %v2896_v26  ;;  %v793_v61 = vmul.f32 %v2931_v38, %v626_v43  ;;  %4203 = vst [vmem:[#allocation51_spill] sm:$0xff] %v3190_v29 }
 0x17b   : > { %v3170_v53 = vmul.f32 %v3128_v22, %v650_v45  ;;  %v3173_v40 = vmul.f32 %v3136_v19, %v654_v0  ;;  %v824_v45 = vadd.f32 %v816_v55, %v792_v41  ;;  %v3200_v38 = vmul.f32 %v2883_v5, %v2959_v46 }
 0x17c   : > { %v1368_v55 = vsel %vm597_vm1, %v3103_v7, %v1349_v2  ;;  %v818_v5 = vmul.f32 %v2832_v49, %v2923_v24  ;;  %v3218_v3 = vadd.f32 %v729_v37, %v705_v39  ;;  %v825_v9 = vadd.f32 %v817_v34, %v793_v61 }
 0x17d   : > { %v1351_v20 = vpop.permute.xlu1 %1350  ;;  %v848_v0 = vmul.f32 %v2835_v50, %v3170_v53  ;;  %4204 = vst [vmem:[#allocation52_spill] sm:$0xff] %v3200_v38  ;;  %v849_v41 = vmul.f32 %v2835_v50, %v3173_v40  ;;  %v3216_v38 = vadd.f32 %v728_v16, %v704_v15  ;;  %v1364_v50 = vsel %vm597_vm1, %v1349_v2, %v3103_v7 }
 0x17e   : > { %v590_v44 = vpop.permute.xlu0 %589  ;;  %v995_v37 = vmul.f32 %v3069_v31, %v3170_v53  ;;  %v1396_v15 = vsel %vm649_vm2, %v3099_v17, %v3114_v42  ;;  %v3245_v61 = vmul.f32 %v1364_v50, %v3125_v62 }
 0x17f   : > { %v603_v56 = vsel %vm597_vm1, %v590_v44, %v582_v30  ;;  %v856_v26 = vadd.f32 %v848_v0, %v824_v45  ;;  %v599_v21 = vsel %vm597_vm1, %v582_v30, %v590_v44  ;;  %v819_v30 = vmul.f32 %v2832_v49, %v2942_v28 }
 0x180   : > { %v3208_v29 = vmul.f32 %v3123_v23, %v603_v56  ;;  %v939_v56 = vmul.f32 %v2838_v51, %v625_v14  ;;  %v3228_v44 = vmul.f32 %v1368_v55, %v3123_v23  ;;  %v628_v7 = vmul.f32 %v3125_v62, %v599_v21  ;;  %4206 = vst [vmem:[#allocation54_spill] sm:$0xff] %v3245_v61 }
 0x181   : > { %v3212_v47 = vpop.permute.xlu1 %1382  ;;  %864 = vrot.lane.b32.xlu1 %v856_v26, %s2559_s18  ;;  %v857_v49 = vadd.f32 %v849_v41, %v825_v9  ;;  %v940_v0 = vmul.f32 %v2838_v51, %v626_v43 }
 0x182   : > { %v644_v45 = vpop.permute.xlu0 %643  ;;  %4205 = vst [vmem:[#allocation53_spill] sm:$0xff] %v3228_v44  ;;  %v794_v14 = vmul.f32 %v2828_v48, %v3208_v29  ;;  %v971_v55 = vadd.f32 %v963_v8, %v939_v56  ;;  %v1520_v51 = vmul.f32 %v2962_v35, %v3228_v44  ;;  %v996_v56 = vmul.f32 %v3069_v31, %v3173_v40 }
 0x183   : > { %v651_v39 = vsel %vm649_vm2, %v636_v32, %v644_v45  ;;  %v655_v2 = vsel %vm649_vm2, %v644_v45, %v636_v32  ;;  %v965_v32 = vmul.f32 %v2846_v54, %v2923_v24  ;;  %v795_v45 = vmul.f32 %v2828_v48, %v628_v7 }
 0x184   : > { %v678_v34 = vmul.f32 %v3128_v22, %v651_v39  ;;  %v3251_v26 = vmul.f32 %v3136_v19, %v655_v2  ;;  %v826_v39 = vadd.f32 %v818_v5, %v794_v14  ;;  %v730_v2 = vmul.f32 %v3050_v36, %v2923_v24 }
 0x185   : > { %v1359_v16 = vpop.permute.xlu1 %1358  ;;  %872 = vrot.lane.b32.xlu1 %v857_v49, %s2559_s18  ;;  %v3275_v49 = vmul.f32 %v1396_v15, %v3128_v22  ;;  %v1400_v48 = vsel %vm649_vm2, %v3114_v42, %v3099_v17  ;;  %v972_v31 = vadd.f32 %v3160_v13, %v940_v0  ;;  %v1458_v14 = vmul.f32 %v3097_v6, %v2939_v10 }
 0x186   : > { %v3253_v21 = vpop.permute.xlu0 %1352  ;;  %v1365_v9 = vsel %vm597_vm1, %v1351_v20, %v1359_v16  ;;  %v1369_v41 = vsel %vm597_vm1, %v1359_v16, %v1351_v20  ;;  %v850_v50 = vmul.f32 %v3023_v18, %v678_v34  ;;  %v1003_v20 = vadd.f32 %v995_v37, %v971_v55 }
 0x187   : > { %v3263_v43 = vmul.f32 %v1369_v41, %v3123_v23  ;;  %v3266_v8 = vmul.f32 %v1365_v9, %v3125_v62  ;;  %4207 = vst [vmem:[#allocation55_spill] sm:$0xff] %v3275_v49  ;;  %v851_v37 = vmul.f32 %v3023_v18, %v3251_v26  ;;  %v1459_v42 = vmul.f32 %v3097_v6, %v2959_v46 }
 0x188   : > { %v858_v24 = vadd.f32 %v850_v50, %v826_v39  ;;  %v1521_v17 = vmul.f32 %v2962_v35, %v3245_v61  ;;  %v1552_v13 = vadd.f32 %v3144_v57, %v1520_v51  ;;  %v941_v15 = vmul.f32 %v2842_v52, %v3208_v29 }
 0x189   : > { %v1434_v16 = vmul.f32 %v3095_v60, %v3263_v43  ;;  %v1435_v9 = vmul.f32 %v3095_v60, %v3266_v8  ;;  %v1391_v41 = vpop.permute.xlu1 %1390  ;;  %1011 = vrot.lane.b32.xlu1 %v1003_v20, %s2560_s19  ;;  %v731_v60 = vmul.f32 %v3050_v36, %v2942_v28  ;;  %v827_v18 = vadd.f32 %v819_v30, %v795_v45 }
 0x18a   : > { %v3286_v5 = vpop.permute.xlu0 %645  ;;  %866 = vrot.lane.b32.xlu0 %v858_v24, %s2559_s18  ;;  %v1004_v0 = vadd.f32 %v996_v56, %v972_v31  ;;  %v3304_v36 = vmul.f32 %v1400_v48, %v3136_v19  ;;  %v1576_v10 = vmul.f32 %v2892_v12, %v3275_v49  ;;  %v706_v6 = vmul.f32 %v3087_v1, %v3208_v29 }
 0x18b   : > { %v707_v46 = vmul.f32 %v3087_v1, %v628_v7  ;;  %v859_v55 = vadd.f32 %v851_v37, %v827_v18  ;;  %v997_v30 = vmul.f32 %v2861_v59, %v678_v34  ;;  %v3317_v51 = vadd.f32 %v1458_v14, %v1434_v16  ;;  %v4214_v37 = vld [vmem:[#allocation10_spill] sm:$0xff] }
 0x18c   : > { %4208 = vst [vmem:[#allocation56_spill] sm:$0xff] %v3304_v36  ;;  %v3319_v50 = vadd.f32 %v1459_v42, %v1435_v9  ;;  %v1553_v56 = vadd.f32 %v3156_v25, %v1521_v17  ;;  %v762_v45 = vmul.f32 %v3058_v63, %v678_v34  ;;  %v763_v29 = vmul.f32 %v3058_v63, %v3251_v26  ;;  %v4216_v42 = vld [vmem:[#allocation31_spill] sm:$0xff] }
 0x18d   : > { %v3311_v35 = vpop.permute.xlu1 %583  ;;  %1019 = vrot.lane.b32.xlu1 %v1004_v0, %s2560_s19  ;;  %4209 = vst [vmem:[#allocation57_spill] sm:$0xff] %v3317_v51  ;;  %v1397_v1 = vsel %vm649_vm2, %v3212_v47, %v1391_v41  ;;  %v1648_v39 = vmul.f32 %v3053_v4, %v3228_v44  ;;  %v942_v20 = vmul.f32 %v2842_v52, %v628_v7  ;;  %v4220_v0 = vld [vmem:[#allocation3_spill] sm:$0xff]  ;;  %v4240_v44 = vld [vmem:[#allocation29_spill] sm:$0xff] }
 0x18e   : > { %v3313_v57 = vpop.permute.xlu0 %1360  ;;  %4210 = vst [vmem:[#allocation58_spill] sm:$0xff] %v3319_v50  ;;  %874 = vrot.lane.b32.xlu0 %v859_v55, %s2559_s18  ;;  %v973_v16 = vadd.f32 %v965_v32, %v941_v15  ;;  %v1584_v9 = vadd.f32 %v1576_v10, %v1552_v13  ;;  %v1577_v25 = vmul.f32 %v2892_v12, %v3304_v36  ;;  %v4218_v15 = vld [vmem:[#allocation8_spill] sm:$0xff]  ;;  %v4247_v50 = vld [vmem:[#allocation38_spill] sm:$0xff] }
 0x18f   : > { %v966_v63 = vmul.f32 %v2846_v54, %v2942_v28  ;;  %v739_v48 = vadd.f32 %v731_v60, %v707_v46  ;;  %v738_v31 = vadd.f32 %v730_v2, %v706_v6  ;;  %v1401_v24 = vsel %vm649_vm2, %v1391_v41, %v3212_v47  ;;  %v4221_v6 = vld [vmem:[#allocation18_spill] sm:$0xff] }
 0x190   : > { %v3342_v52 = vmul.f32 %v1397_v1, %v3128_v22  ;;  %v1005_v32 = vadd.f32 %v997_v30, %v973_v16  ;;  %v998_v12 = vmul.f32 %v2861_v59, %v3251_v26  ;;  %v1649_v54 = vmul.f32 %v3053_v4, %v3245_v61  ;;  %v4215_v26 = vld [vmem:[#allocation28_spill] sm:$0xff]  ;;  %v4222_v30 = vld [vmem:[#allocation11_spill] sm:$0xff]  ;;  %v4224_v1 = vld [vmem:[#allocation30_spill] sm:$0xff] }
 0x191   : > { %v3334_v34 = vpop.permute.xlu1 %637  ;;  %1592 = vrot.lane.b32.xlu1 %v1584_v9, %s2559_s18  ;;  %v3353_v28 = vmul.f32 %v2857_v58, %v2994_v27  ;;  %v3355_v2 = vadd.f32 %v763_v29, %v739_v48  ;;  %v3357_v47 = vadd.f32 %v762_v45, %v738_v31  ;;  %v1680_v41 = vadd.f32 %v3177_v11, %v1648_v39  ;;  %v4219_v11 = vld [vmem:[#allocation24_spill] sm:$0xff]  ;;  %v4223_v45 = vld [vmem:[#allocation22_spill] sm:$0xff]  ;;  %v4225_v16 = vld [vmem:[#allocation7_spill] sm:$0xff] }
 0x192   : > { %4211 = vst [vmem:[#allocation59_spill] sm:$0xff] %v3342_v52  ;;  %v3344_v7 = vpop.permute.xlu0 %585  ;;  %v1522_v60 = vmul.f32 %v4214_v37, %v3263_v43  ;;  %1013 = vrot.lane.b32.xlu0 %v1005_v32, %s2560_s19  ;;  %v974_v14 = vadd.f32 %v966_v63, %v942_v20  ;;  %v1585_v59 = vadd.f32 %v1577_v25, %v1553_v56  ;;  %v4226_v63 = vld [vmem:[#allocation50_spill] sm:$0xff] }
 0x193   : > { %4212 = vst [vmem:[#allocation60_spill] sm:$0xff] %v3355_v2  ;;  %4213 = vst [vmem:[#allocation61_spill] sm:$0xff] %v3357_v47  ;;  %v3365_v4 = vmul.f32 %v4216_v42, %v4215_v26  ;;  %v3368_v17 = vmul.f32 %v1401_v24, %v3136_v19  ;;  %v3374_v18 = vmul.f32 %v4218_v15, %v2994_v27 }
 0x194   : > { %v820_v10 = vmul.f32 %v4220_v0, %v4219_v11  ;;  %v1704_v46 = vmul.f32 %v4221_v6, %v3275_v49  ;;  %v1006_v55 = vadd.f32 %v998_v12, %v974_v14  ;;  %v1578_v56 = vmul.f32 %v4222_v30, %v3342_v52  ;;  %v4228_v14 = vld [vmem:[#allocation34_spill] sm:$0xff]  ;;  %v4233_v49 = vld [vmem:[#allocation25_spill] sm:$0xff] }
 0x195   : > { %4217 = vst [vmem:[#allocation10_spill] sm:$0xff] %v3368_v17  ;;  %v3370_v13 = vpop.permute.xlu1 %1384  ;;  %1600 = vrot.lane.b32.xlu1 %v1585_v59, %s2559_s18  ;;  %v821_v29 = vmul.f32 %v4220_v0, %v4223_v45  ;;  %v3387_v39 = vmul.f32 %v2857_v58, %v4224_v1  ;;  %v3391_v20 = vmul.f32 %v4218_v15, %v4224_v1  ;;  %v4227_v58 = vld [vmem:[#allocation48_spill] sm:$0xff] }
 0x196   : > { %v3395_v9 = vmul.f32 %v4225_v16, %v4219_v11  ;;  %v3399_v25 = vmul.f32 %v4225_v16, %v4223_v45  ;;  %v1681_v48 = vadd.f32 %v4226_v63, %v1649_v54  ;;  %v1523_v31 = vmul.f32 %v4214_v37, %v3266_v8  ;;  %v3404_v24 = vpop.permute.xlu0 %1386  ;;  %1021 = vrot.lane.b32.xlu0 %v1006_v55, %s2560_s19  ;;  %v4229_v15 = vld [vmem:[#allocation20_spill] sm:$0xff] }
 0x197   : > { %v1554_v32 = vadd.f32 %v4227_v58, %v1522_v60  ;;  %v1712_v12 = vadd.f32 %v1704_v46, %v1680_v41  ;;  %v3410_v59 = vmul.f32 %v4216_v42, %v4228_v14  ;;  %v4230_v0 = vld [vmem:[#allocation16_spill] sm:$0xff]  ;;  %v1705_v54 = vmul.f32 %v4221_v6, %v3304_v36  ;;  %v4231_v58 = vld [vmem:[#allocation49_spill] sm:$0xff] }
 0x198   : > { %v1548_v16 = vmul.f32 %v4230_v0, %v4229_v15  ;;  %v1579_v37 = vmul.f32 %v4222_v30, %v3368_v17  ;;  %v652_v60 = vsel %vm649_vm2, %v3334_v34, %v3286_v5  ;;  %v1366_v6 = vsel %vm597_vm1, %v3253_v21, %v3313_v57 }
 0x199   : > { %v592_v63 = vpop.permute.xlu1 %591  ;;  %v1586_v41 = vadd.f32 %v1578_v56, %v1554_v32  ;;  %1720 = vrot.lane.b32.xlu1 %v1712_v12, %s2560_s19  ;;  %v1370_v55 = vsel %vm597_vm1, %v3313_v57, %v3253_v21  ;;  %v1555_v32 = vadd.f32 %v4231_v58, %v1523_v31  ;;  %v1713_v36 = vadd.f32 %v1705_v54, %v1681_v48  ;;  %v4234_v21 = vld [vmem:[#allocation19_spill] sm:$0xff] }
 0x19a   : > { %v600_v42 = vsel %vm597_vm1, %v3311_v35, %v592_v63  ;;  %v604_v46 = vsel %vm597_vm1, %v592_v63, %v3311_v35  ;;  %v4232_v35 = vld [vmem:[#allocation13_spill] sm:$0xff]  ;;  %v1549_v61 = vmul.f32 %v4230_v0, %v4233_v49  ;;  %v1706_v57 = vmul.f32 %v4234_v21, %v3342_v52  ;;  %v594_v0 = vpop.permute.xlu0 %593 }
 0x19b   : > { %v629_v30 = vmul.f32 %v3123_v23, %v604_v46  ;;  %v3439_v56 = vmul.f32 %v3125_v62, %v600_v42  ;;  %v1650_v12 = vmul.f32 %v4232_v35, %v3263_v43  ;;  %v1651_v63 = vmul.f32 %v4232_v35, %v3266_v8  ;;  %1594 = vrot.lane.b32.xlu0 %v1586_v41, %s2559_s18  ;;  %v4235_v46 = vld [vmem:[#allocation2_spill] sm:$0xff] }
 0x19c   : > { %v3452_v42 = vmul.f32 %v3128_v22, %v652_v60  ;;  %v3456_v43 = vmul.f32 %v1370_v55, %v3123_v23  ;;  %v3459_v8 = vmul.f32 %v1366_v6, %v3125_v62  ;;  %v656_v48 = vsel %vm649_vm2, %v3286_v5, %v3334_v34  ;;  %v4238_v60 = vld [vmem:[#allocation27_spill] sm:$0xff] }
 0x19d   : > { %v796_v31 = vmul.f32 %v4235_v46, %v629_v30  ;;  %v1393_v58 = vpop.permute.xlu1 %1392  ;;  %v1587_v54 = vadd.f32 %v1579_v37, %v1555_v32  ;;  %1728 = vrot.lane.b32.xlu1 %v1713_v36, %s2560_s19  ;;  %v1676_v41 = vmul.f32 %v4238_v60, %v4229_v15  ;;  %v3470_v35 = vmul.f32 %v4238_v60, %v4233_v49  ;;  %v4241_v36 = vld [vmem:[#allocation51_spill] sm:$0xff]  ;;  %v4242_v37 = vld [vmem:[#allocation52_spill] sm:$0xff] }
 0x19e   : > { %4236 = vst [vmem:[#allocation31_spill] sm:$0xff] %v3456_v43  ;;  %4237 = vst [vmem:[#allocation8_spill] sm:$0xff] %v3459_v8  ;;  %v797_v6 = vmul.f32 %v4235_v46, %v3439_v56  ;;  %v3476_v2 = vmul.f32 %v4240_v44, %v4215_v26  ;;  %v3480_v5 = vmul.f32 %v4240_v44, %v4228_v14  ;;  %v4246_v26 = vld [vmem:[#allocation5_spill] sm:$0xff] }
 0x19f   : > { %4239 = vst [vmem:[#allocation24_spill] sm:$0xff] %v3470_v35  ;;  %v828_v55 = vadd.f32 %v820_v10, %v796_v31  ;;  %v1682_v34 = vadd.f32 %v4241_v36, %v1650_v12  ;;  %v1683_v32 = vadd.f32 %v4242_v37, %v1651_v63  ;;  %1602 = vrot.lane.b32.xlu0 %v1587_v54, %s2559_s18  ;;  %v4243_v10 = vld [vmem:[#allocation4_spill] sm:$0xff]  ;;  %v4244_v12 = vld [vmem:[#allocation23_spill] sm:$0xff]  ;;  %v4245_v54 = vld [vmem:[#allocation26_spill] sm:$0xff] }
 0x1a0   : > { %v1707_v60 = vmul.f32 %v4234_v21, %v3368_v17  ;;  %v3488_v46 = vmul.f32 %v3136_v19, %v656_v48  ;;  %v852_v31 = vmul.f32 %v4243_v10, %v3452_v42  ;;  %v605_v44 = vsel %vm597_vm1, %v594_v0, %v3344_v7 }
 0x1a1   : > { %v640_v47 = vpop.permute.xlu1 %639  ;;  %v1524_v36 = vmul.f32 %v4244_v12, %v3456_v43  ;;  %v1525_v63 = vmul.f32 %v4244_v12, %v3459_v8  ;;  %v1652_v21 = vmul.f32 %v4245_v54, %v3456_v43  ;;  %v1714_v37 = vadd.f32 %v1706_v57, %v1682_v34  ;;  %v4248_v12 = vld [vmem:[#allocation40_spill] sm:$0xff] }
 0x1a2   : > { %v601_v48 = vsel %vm597_vm1, %v3344_v7, %v594_v0  ;;  %v829_v14 = vadd.f32 %v821_v29, %v797_v6  ;;  %v943_v49 = vmul.f32 %v4246_v26, %v629_v30  ;;  %v860_v15 = vadd.f32 %v852_v31, %v828_v55 }
 0x1a3   : > { %v3507_v51 = vmul.f32 %v4247_v50, %v4219_v11  ;;  %v3511_v17 = vmul.f32 %v4247_v50, %v4223_v45  ;;  %v734_v43 = vmul.f32 %v4248_v12, %v2994_v27  ;;  %v631_v57 = vmul.f32 %v3123_v23, %v605_v44  ;;  %1722 = vrot.lane.b32.xlu0 %v1714_v37, %s2560_s19  ;;  %v4251_v44 = vld [vmem:[#allocation37_spill] sm:$0xff] }
 0x1a4   : > { %v735_v7 = vmul.f32 %v4248_v12, %v4224_v1  ;;  %v3521_v29 = vmul.f32 %v4245_v54, %v3459_v8  ;;  %v853_v11 = vmul.f32 %v4243_v10, %v3488_v46  ;;  %868 = vrot.lane.b32.xlu1 %v860_v15, %s2559_s18  ;;  %v1715_v50 = vadd.f32 %v1707_v60, %v1683_v32  ;;  %v4249_v15 = vld [vmem:[#allocation9_spill] sm:$0xff] }
 0x1a5   : > { %v1355_v45 = vpop.permute.xlu1 %1354  ;;  %v1556_v0 = vadd.f32 %v1548_v16, %v1524_v36  ;;  %v3526_v27 = vadd.f32 %v1549_v61, %v1525_v63  ;;  %v632_v6 = vmul.f32 %v3125_v62, %v601_v48  ;;  %v1398_v1 = vsel %vm649_vm2, %v3370_v13, %v1393_v58  ;;  %v4250_v16 = vld [vmem:[#allocation17_spill] sm:$0xff] }
 0x1a6   : > { %v3532_v55 = vadd.f32 %v1676_v41, %v1652_v21  ;;  %v944_v34 = vmul.f32 %v4246_v26, %v3439_v56  ;;  %v975_v10 = vadd.f32 %v3395_v9, %v943_v49  ;;  %v861_v31 = vadd.f32 %v853_v11, %v829_v14  ;;  %v4252_v41 = vld [vmem:[#allocation44_spill] sm:$0xff] }
 0x1a7   : > { %v999_v32 = vmul.f32 %v4249_v15, %v3452_v42  ;;  %v1000_v61 = vmul.f32 %v4249_v15, %v3488_v46  ;;  %v798_v60 = vmul.f32 %v4250_v16, %v631_v57  ;;  %v3543_v36 = vmul.f32 %v4251_v44, %v629_v30  ;;  %1730 = vrot.lane.b32.xlu0 %v1715_v50, %s2560_s19  ;;  %v4253_v50 = vld [vmem:[#allocation6_spill] sm:$0xff] }
 0x1a8   : > { %v710_v63 = vmul.f32 %v4252_v41, %v631_v57  ;;  %v3549_v26 = vmul.f32 %v4251_v44, %v3439_v56  ;;  %v1402_v49 = vsel %vm649_vm2, %v1393_v58, %v3370_v13  ;;  %v3555_v9 = vmul.f32 %v1398_v1, %v3128_v22  ;;  %876 = vrot.lane.b32.xlu1 %v861_v31, %s2559_s18  ;;  %v4255_v44 = vld [vmem:[#allocation42_spill] sm:$0xff] }
 0x1a9   : > { %v648_v14 = vpop.permute.xlu1 %647  ;;  %v711_v30 = vmul.f32 %v4252_v41, %v632_v6  ;;  %v799_v54 = vmul.f32 %v4250_v16, %v632_v6  ;;  %v976_v37 = vadd.f32 %v3399_v25, %v944_v34  ;;  %v1007_v12 = vadd.f32 %v999_v32, %v975_v10  ;;  %v4254_v16 = vld [vmem:[#allocation35_spill] sm:$0xff]  ;;  %v4256_v41 = vld [vmem:[#allocation33_spill] sm:$0xff] }
 0x1aa   : > { %v653_v21 = vsel %vm649_vm2, %v640_v47, %v648_v14  ;;  %v657_v56 = vsel %vm649_vm2, %v648_v14, %v640_v47  ;;  %v830_v11 = vadd.f32 %v3353_v28, %v798_v60  ;;  %v945_v1 = vmul.f32 %v4253_v50, %v631_v57 }
 0x1ab   : > { %v682_v13 = vmul.f32 %v3128_v22, %v653_v21  ;;  %v683_v58 = vmul.f32 %v3136_v19, %v657_v56  ;;  %v1430_v48 = vpop.permute.xlu0 %1429  ;;  %v946_v31 = vmul.f32 %v4253_v50, %v632_v6  ;;  %v3571_v15 = vmul.f32 %v1402_v49, %v3136_v19 }
 0x1ac   : > { %v1580_v47 = vmul.f32 %v4254_v16, %v3555_v9  ;;  %1015 = vrot.lane.b32.xlu1 %v1007_v12, %s2560_s19  ;;  %v742_v6 = vadd.f32 %v734_v43, %v710_v63  ;;  %v743_v32 = vadd.f32 %v735_v7, %v711_v30  ;;  %v1008_v21 = vadd.f32 %v1000_v61, %v976_v37  ;;  %v4257_v7 = vld [vmem:[#allocation39_spill] sm:$0xff]  ;;  %v4259_v37 = vld [vmem:[#allocation36_spill] sm:$0xff] }
 0x1ad   : > { %v766_v25 = vmul.f32 %v4255_v44, %v682_v13  ;;  %v767_v34 = vmul.f32 %v4255_v44, %v683_v58  ;;  %v854_v14 = vmul.f32 %v4256_v41, %v682_v13  ;;  %v1363_v10 = vpop.permute.xlu1 %1362  ;;  %v831_v50 = vadd.f32 %v3387_v39, %v799_v54  ;;  %v4258_v30 = vld [vmem:[#allocation15_spill] sm:$0xff] }
 0x1ae   : > { %v1367_v28 = vsel %vm597_vm1, %v1355_v45, %v1363_v10  ;;  %v1371_v57 = vsel %vm597_vm1, %v1363_v10, %v1355_v45  ;;  %v855_v44 = vmul.f32 %v4256_v41, %v683_v58  ;;  %v977_v35 = vadd.f32 %v3374_v18, %v945_v1 }
 0x1af   : > { %v1378_v60 = vmul.f32 %v1371_v57, %v3123_v23  ;;  %v1379_v49 = vmul.f32 %v1367_v28, %v3125_v62  ;;  %v862_v56 = vadd.f32 %v854_v14, %v830_v11  ;;  %v3587_v8 = vadd.f32 %v767_v34, %v743_v32 }
 0x1b0   : > { %v746_v12 = vpop.permute.xlu0 %745  ;;  %v3589_v52 = vadd.f32 %v766_v25, %v742_v6  ;;  %v1581_v43 = vmul.f32 %v4254_v16, %v3571_v15  ;;  %v1001_v23 = vmul.f32 %v4257_v7, %v682_v13  ;;  %1023 = vrot.lane.b32.xlu1 %v1008_v21, %s2560_s19  ;;  %v1588_v62 = vadd.f32 %v1580_v47, %v1556_v0 }
 0x1b1   : > { %v760_v45 = vmul.f32 %v746_v12, %v3170_v53  ;;  %v761_v39 = vmul.f32 %v746_v12, %v3173_v40  ;;  %870 = vrot.lane.b32.xlu0 %v862_v56, %s2559_s18  ;;  %v3599_v61 = vmul.f32 %v1430_v48, %v1378_v60  ;;  %v3601_v63 = vmul.f32 %v1430_v48, %v1379_v49  ;;  %v4260_v48 = vld [vmem:[#allocation41_spill] sm:$0xff]  ;;  %v4264_v12 = vld [vmem:[#allocation59_spill] sm:$0xff] }
 0x1b2   : > { %v1526_v18 = vmul.f32 %v4258_v30, %v1378_v60  ;;  %v1527_v54 = vmul.f32 %v4258_v30, %v1379_v49  ;;  %v1654_v11 = vmul.f32 %v4259_v37, %v1378_v60  ;;  %v1655_v13 = vmul.f32 %v4259_v37, %v1379_v49  ;;  %v3680_v37 = vld [vmem:[%s4070_s6] sm:$0xff] }
 0x1b3   : > { %v978_v0 = vadd.f32 %v3391_v20, %v946_v31  ;;  %v3609_v53 = vadd.f32 %v760_v45, %v3216_v38  ;;  %v3612_v40 = vadd.f32 %v761_v39, %v3218_v3  ;;  %v863_v16 = vadd.f32 %v855_v44, %v831_v50  ;;  %v4266_v39 = vld [vmem:[#allocation57_spill] sm:$0xff] }
 0x1b4   : > { %v1395_v1 = vpop.permute.xlu0 %1394  ;;  %v1708_v47 = vmul.f32 %v4260_v48, %v3555_v9  ;;  %1596 = vrot.lane.b32.xlu1 %v1588_v62, %s2559_s18  ;;  %v1589_v38 = vadd.f32 %v1581_v43, %v3526_v27  ;;  %v1002_v3 = vmul.f32 %v4257_v7, %v683_v58  ;;  %v1009_v41 = vadd.f32 %v1001_v23, %v977_v35  ;;  %v4261_v27 = vld [vmem:[#allocation21_spill] sm:$0xff]  ;;  %v4265_v7 = vld [vmem:[#allocation10_spill] sm:$0xff] }
 0x1b5   : > { %v1399_v25 = vsel %vm649_vm2, %v3404_v24, %v1395_v1  ;;  %v1403_v34 = vsel %vm649_vm2, %v1395_v1, %v3404_v24  ;;  %878 = vrot.lane.b32.xlu0 %v863_v16, %s2559_s18  ;;  %v1558_v14 = vadd.f32 %v3365_v4, %v1526_v18  ;;  %v1559_v10 = vadd.f32 %v3410_v59, %v1527_v54  ;;  %v4269_v1 = vld [vmem:[#allocation8_spill] sm:$0xff] }
 0x1b6   : > { %v3626_v20 = vmul.f32 %v1399_v25, %v3128_v22  ;;  %v3629_v31 = vmul.f32 %v1403_v34, %v3136_v19  ;;  %v1686_v24 = vadd.f32 %v3476_v2, %v1654_v11  ;;  %v1687_v28 = vadd.f32 %v3480_v5, %v1655_v13  ;;  %v4262_v19 = vld [vmem:[#allocation32_spill] sm:$0xff]  ;;  %v4268_v13 = vld [vmem:[#allocation31_spill] sm:$0xff]  ;;  %v4271_v25 = vld [vmem:[#allocation25_spill] sm:$0xff] }
 0x1b7   : > { %v740_v4 = vadd.f32 %v3507_v51, %v3543_v36  ;;  %v741_v2 = vadd.f32 %v3511_v17, %v3549_v26  ;;  %v1709_v56 = vmul.f32 %v4260_v48, %v3571_v15  ;;  %v1716_v17 = vadd.f32 %v1708_v47, %v3532_v55  ;;  %v4263_v36 = vld [vmem:[#allocation24_spill] sm:$0xff]  ;;  %v4267_v55 = vld [vmem:[#allocation58_spill] sm:$0xff] }
 0x1b8   : > { %v1582_v58 = vmul.f32 %v4261_v27, %v3626_v20  ;;  %v1583_v22 = vmul.f32 %v4261_v27, %v3629_v31  ;;  %v1710_v57 = vmul.f32 %v4262_v19, %v3626_v20  ;;  %v1711_v35 = vmul.f32 %v4262_v19, %v3629_v31  ;;  %v754_v6 = vpop.permute.xlu0 %753  ;;  %1604 = vrot.lane.b32.xlu1 %v1589_v38, %s2559_s18  ;;  %v4270_v48 = vld [vmem:[#allocation20_spill] sm:$0xff]  ;;  %v4273_v27 = vld [vmem:[#allocation34_spill] sm:$0xff] }
 0x1b9   : > { %v764_v59 = vmul.f32 %v754_v6, %v3452_v42  ;;  %v765_v5 = vmul.f32 %v754_v6, %v3488_v46  ;;  %1017 = vrot.lane.b32.xlu0 %v1009_v41, %s2560_s19  ;;  %v1010_v46 = vadd.f32 %v1002_v3, %v978_v0  ;;  %v1685_v26 = vadd.f32 %v4263_v36, %v3521_v29  ;;  %v1904_v36 = vld [vmem:[%s4073_s9 + $0x38] sm:$0xff] }
 0x1ba   : > { %v1590_v32 = vadd.f32 %v1582_v58, %v1558_v14  ;;  %v1591_v60 = vadd.f32 %v1583_v22, %v1559_v10  ;;  %v1718_v49 = vadd.f32 %v1710_v57, %v1686_v24  ;;  %v1719_v21 = vadd.f32 %v1711_v35, %v1687_v28  ;;  %v4272_v24 = vld [vmem:[#allocation28_spill] sm:$0xff]  ;;  %v3707_v57 = vld [vmem:[%s4070_s6 + $0x8] sm:$0xff] }
 0x1bb   : > { %v3654_v50 = vadd.f32 %v764_v59, %v740_v4  ;;  %v3656_v51 = vadd.f32 %v765_v5, %v741_v2  ;;  %v1717_v62 = vadd.f32 %v1709_v56, %v1685_v26  ;;  %v3715_v2 = vld [vmem:[%s4070_s6 + $0x18] sm:$0xff]  ;;  %v397_v59 = vld [vmem:[%s4071_s7] sm:$0xff] }
 0x1bc   : > { %v3659_v42 = vpop.permute.xlu0 %1473  ;;  %1724 = vrot.lane.b32.xlu1 %v1716_v17, %s2560_s19  ;;  %v1897_v5 = vld [vmem:[%s4073_s9] sm:$0xff]  ;;  %v1900_v56 = vld [vmem:[%s4073_s9 + $0x18] sm:$0xff]  ;;  %v1903_v17 = vld [vmem:[%s4073_s9 + $0x30] sm:$0xff] }
 0x1bd   : > { %1025 = vrot.lane.b32.xlu0 %v1010_v46, %s2560_s19  ;;  %v1902_v46 = vld [vmem:[%s4073_s9 + $0x28] sm:$0xff] }
 0x1be   : > { %v1478_v44 = vpop.permute.xlu1 %1477 }
 0x1bf   : > { %v1490_v43 = vmul.f32 %v1478_v44, %v4264_v12  ;;  %v1491_v23 = vmul.f32 %v1478_v44, %v4265_v7  ;;  %v4274_v12 = vld [vmem:[#allocation46_spill] sm:$0xff] }
 0x1c0   : > { %v1482_v45 = vpop.permute.xlu0 %1481  ;;  %1732 = vrot.lane.b32.xlu1 %v1717_v62, %s2560_s19  ;;  %v895_v7 = vsub.s32 6, %v4274_v12  ;;  %v1042_v62 = vsub.s32 7, %v4274_v12 }
 0x1c1   : > { %v3668_v30 = vadd.f32 %v1490_v43, %v4266_v39  ;;  %v3671_v18 = vadd.f32 %v1491_v23, %v4267_v55  ;;  %v1492_v54 = vmul.f32 %v1482_v45, %v3555_v9  ;;  %v1493_v29 = vmul.f32 %v1482_v45, %v3571_v15  ;;  %1598 = vrot.lane.b32.xlu0 %v1590_v32, %s2559_s18  ;;  %v3689_v9 = vld [vmem:[%s4070_s6 + $0x10] sm:$0xff]  ;;  %v400_v32 = vld [vmem:[%s4071_s7 + $0x18] sm:$0xff]  ;;  %v4275_v39 = vld [vmem:[#allocation47_spill] sm:$0xff] }
 0x1c2   : > { %v891_v43 = vsub.s32 2, %v4274_v12  ;;  %v1038_v23 = vsub.s32 3, %v4274_v12 }
 0x1c3   : > { %v1425_v11 = vpop.permute.xlu1 %1424 }
 0x1c4   : > { %v1436_v0 = vmul.f32 %v1425_v11, %v4268_v13  ;;  %v1437_v16 = vmul.f32 %v1425_v11, %v4269_v1  ;;  %1776 = vrot.lane.b32.xlu1 %v3680_v37, %s2561_s23  ;;  %v892_v55 = vrot.slane %v4275_v39, %v891_v43  ;;  %v1039_v11 = vrot.slane %v4275_v39, %v1038_v23 }
 0x1c5   : > { %1606 = vrot.lane.b32.xlu0 %v1591_v60, %s2559_s18  ;;  %v1899_v60 = vld [vmem:[%s4073_s9 + $0x10] sm:$0xff]  ;;  %v1043_v13 = vrot.slane %v4275_v39, %v1042_v62  ;;  %v4278_v62 = vld [vmem:[#allocation53_spill] sm:$0xff] }
 0x1c6   : > { %v3767_v1 = vrot.slane %v892_v55, %v891_v43  ;;  %v4280_v55 = vld [vmem:[#allocation54_spill] sm:$0xff] }
 0x1c8   : > { %v1450_v15 = vpop.permute.xlu1 %1449  ;;  %1780 = vrot.lane.b32.xlu1 %v3689_v9, %s2561_s23 }
 0x1c9   : > { %v1460_v47 = vmul.f32 %v1450_v15, %v4270_v48  ;;  %v1461_v34 = vmul.f32 %v1450_v15, %v4271_v25  ;;  %1726 = vrot.lane.b32.xlu0 %v1718_v49, %s2560_s19  ;;  %v1898_v49 = vld [vmem:[%s4073_s9 + $0x8] sm:$0xff]  ;;  %v3776_v25 = vrot.slane %v1039_v11, %v1038_v23 }
 0x1cb   : > { %v1468_v38 = vadd.f32 %v1460_v47, %v1436_v0  ;;  %v1469_v3 = vadd.f32 %v1461_v34, %v1437_v16  ;;  %v3778_v34 = vrot.slane %v1043_v13, %v1038_v23 }
 0x1cc   : > { %v1454_v41 = vpop.permute.xlu1 %1453  ;;  %403 = vperm.xlu1 %2465, %v397_v59  }
 0x1cd   : > { %v3695_v14 = vadd.f32 %v1492_v54, %v1468_v38  ;;  %v3697_v10 = vadd.f32 %v1493_v29, %v1469_v3  ;;  %v1462_v28 = vmul.f32 %v1454_v41, %v4272_v24  ;;  %v1463_v58 = vmul.f32 %v1454_v41, %v4273_v27  ;;  %1734 = vrot.lane.b32.xlu0 %v1719_v21, %s2560_s19  ;;  %v1901_v21 = vld [vmem:[%s4073_s9 + $0x20] sm:$0xff] }
 0x1ce   : > { %v896_v54 = vrot.slane %v4275_v39, %v895_v7 }
 0x1cf   : > { %v1470_v22 = vadd.f32 %v1462_v28, %v3599_v61  ;;  %v1471_v19 = vadd.f32 %v1463_v58, %v3601_v63 }
 0x1d0   : > { %v3769_v16 = vrot.slane %v896_v54, %v891_v43 }
 0x1d1   : > { %v1486_v35 = vpop.permute.xlu1 %1485  ;;  %1778 = vrot.lane.b32.xlu0 %v3707_v57, %s2561_s23 }
 0x1d2   : > { %v1494_v6 = vmul.f32 %v1486_v35, %v3626_v20  ;;  %v1495_v4 = vmul.f32 %v1486_v35, %v3629_v31  ;;  %v398_v20 = vld [vmem:[%s4071_s7 + $0x8] sm:$0xff]  ;;  %v399_v31 = vld [vmem:[%s4071_s7 + $0x10] sm:$0xff] }
 0x1d3   : > { %413 = vperm.xlu1 %2465, %v399_v31  }
 0x1d4   : > { %v3717_v61 = vadd.f32 %v1494_v6, %v1470_v22  ;;  %v3719_v63 = vadd.f32 %v1495_v4, %v1471_v19 }
 0x1d5   : > { %1782 = vrot.lane.b32.xlu0 %v3715_v2, %s2561_s23  ;;  %s4037_s23 = scalar_lea.vmem %s4074_s10, %s2640_s21 }
 0x1d7   : > { %418 = vperm.xlu1 %2465, %v400_v32  }
 0x1d9   : > { %408 = vperm.xlu0 %2466, %v398_v20  }
 0x1db   : > { %1912 = vperm.xlu1 %2465, %v1898_v49  }
 0x1dd   : > { %1907 = vperm.xlu0 %2466, %v1897_v5  }
 0x1df   : > { %1922 = vperm.xlu1 %2465, %v1900_v56   ;;  %v4276_v56 = vld [vmem:[#allocation61_spill] sm:$0xff] }
 0x1e1   : > { %1917 = vperm.xlu0 %2466, %v1899_v60  }
 0x1e3   : > { %1932 = vperm.xlu1 %2465, %v1902_v46   ;;  %v4277_v46 = vld [vmem:[#allocation60_spill] sm:$0xff] }
 0x1e5   : > { %1927 = vperm.xlu0 %2466, %v1901_v21  }
 0x1e7   : > { %1942 = vperm.xlu1 %2465, %v1904_v36  }
 0x1e9   : > { %1937 = vperm.xlu0 %2466, %v1903_v17  }
 0x1f3   : > { %v865_v26 = vpop.permute.xlu1 %864 }
 0x1f7   : > { %v873_v44 = vpop.permute.xlu1 %872 }
 0x1f8   : > { %v881_v15 = vsel %vm880_vm3, %v865_v26, %v873_v44  ;;  %v885_v48 = vsel %vm880_vm3, %v873_v44, %v865_v26 }
 0x1f9   : > { %v907_v24 = vmul.f32 %v3767_v1, %v885_v48  ;;  %v908_v28 = vmul.f32 %v3769_v16, %v881_v15  ;;  %v4282_v15 = vld [vmem:[#allocation45_spill] sm:$0xff] }
 0x1fb   : > { %v1012_v45 = vpop.permute.xlu1 %1011  ;;  %v915_v20 = vadd.f32 %v907_v24, %v3609_v53  ;;  %v916_v31 = vadd.f32 %v908_v28, %v3612_v40  ;;  %v4284_v28 = vld [vmem:[#allocation55_spill] sm:$0xff] }
 0x1fc   : > { %v867_v29 = vpop.permute.xlu0 %866 }
 0x1ff   : > { %v1020_v0 = vpop.permute.xlu1 %1019 }
 0x200   : > { %v875_v47 = vpop.permute.xlu0 %874  ;;  %v1028_v38 = vsel %vm1027_vm4, %v1012_v45, %v1020_v0  ;;  %v1032_v3 = vsel %vm1027_vm4, %v1020_v0, %v1012_v45  ;;  %v4279_v45 = vld [vmem:[#allocation43_spill] sm:$0xff]  ;;  %v4281_v0 = vld [vmem:[#allocation12_spill] sm:$0xff] }
 0x201   : > { %v882_v27 = vsel %vm880_vm3, %v867_v29, %v875_v47  ;;  %v886_v58 = vsel %vm880_vm3, %v875_v47, %v867_v29  ;;  %v1054_v19 = vmul.f32 %v3776_v25, %v1028_v38  ;;  %v1055_v35 = vmul.f32 %v3778_v34, %v1032_v3  ;;  %v4283_v47 = vld [vmem:[#allocation14_spill] sm:$0xff] }
 0x202   : > { %v909_v6 = vmul.f32 %v3767_v1, %v886_v58  ;;  %v910_v4 = vmul.f32 %v3769_v16, %v882_v27  ;;  %v1432_v39 = vmul.f32 %v4279_v45, %v4278_v62  ;;  %v1433_v54 = vmul.f32 %v4279_v45, %v4280_v55  ;;  %v4285_v58 = vld [vmem:[#allocation56_spill] sm:$0xff] }
 0x203   : > { %v1593_v41 = vpop.permute.xlu1 %1592  ;;  %v1062_v32 = vadd.f32 %v1054_v19, %v915_v20  ;;  %v1063_v60 = vadd.f32 %v1055_v35, %v916_v31  ;;  %v1456_v48 = vmul.f32 %v4282_v15, %v4281_v0  ;;  %v1457_v38 = vmul.f32 %v4282_v15, %v4283_v47 }
 0x204   : > { %v1014_v22 = vpop.permute.xlu0 %1013  ;;  %v917_v17 = vadd.f32 %v909_v6, %v4276_v56  ;;  %v918_v36 = vadd.f32 %v910_v4, %v4277_v46  ;;  %v1488_v27 = vmul.f32 %v3659_v42, %v4284_v28 }
 0x205   : > { %v1070_v7 = vmax.f32 %v1062_v32, 0.0  ;;  %v1071_v23 = vmax.f32 %v1063_v60, 0.0  ;;  %v1464_v32 = vadd.f32 %v1456_v48, %v1432_v39  ;;  %v1465_v60 = vadd.f32 %v1457_v38, %v1433_v54 }
 0x207   : > { %v1601_v59 = vpop.permute.xlu1 %1600  ;;  %v1078_v4 = vmin.f32 %v1070_v7, 6.0  ;;  %v1079_v20 = vmin.f32 %v1071_v23, 6.0 }
 0x208   : > { %v1022_v5 = vpop.permute.xlu0 %1021  ;;  %v1608_v3 = vsel %vm880_vm3, %v1593_v41, %v1601_v59  ;;  %v1612_v24 = vsel %vm880_vm3, %v1601_v59, %v1593_v41 }
 0x209   : > { %v1029_v49 = vsel %vm1027_vm4, %v1014_v22, %v1022_v5  ;;  %v1033_v21 = vsel %vm1027_vm4, %v1022_v5, %v1014_v22  ;;  %v1489_v22 = vmul.f32 %v3659_v42, %v4285_v58  ;;  %v1616_v41 = vmul.f32 %v1612_v24, %v3767_v1 }
 0x20a   : > { %v1056_v26 = vmul.f32 %v3776_v25, %v1029_v49  ;;  %v1057_v44 = vmul.f32 %v3778_v34, %v1033_v21  ;;  %v1617_v59 = vmul.f32 %v1608_v3, %v3769_v16 }
 0x20b   : > { %v1721_v53 = vpop.permute.xlu1 %1720  ;;  %v1497_v46 = vadd.f32 %v1489_v22, %v1465_v60 }
 0x20c   : > { %v1064_v12 = vadd.f32 %v1056_v26, %v917_v17  ;;  %v1065_v40 = vadd.f32 %v1057_v44, %v918_v36  ;;  %v1496_v17 = vadd.f32 %v1488_v27, %v1464_v32 }
 0x20d   : > { %v1595_v43 = vpop.permute.xlu0 %1594 }
 0x20e   : > { %v1072_v29 = vmax.f32 %v1064_v12, 0.0  ;;  %v1073_v11 = vmax.f32 %v1065_v40, 0.0  ;;  %v1624_v12 = vadd.f32 %v1616_v41, %v1496_v17  ;;  %v1625_v40 = vadd.f32 %v1617_v59, %v1497_v46 }
 0x20f   : > { %v1729_v13 = vpop.permute.xlu1 %1728 }
 0x210   : > { %v1080_v19 = vmin.f32 %v1072_v29, 6.0  ;;  %v1081_v35 = vmin.f32 %v1073_v11, 6.0  ;;  %v1736_v31 = vsel %vm1027_vm4, %v1721_v53, %v1729_v13  ;;  %v1740_v5 = vsel %vm1027_vm4, %v1729_v13, %v1721_v53 }
 0x211   : > { %v1603_v6 = vpop.permute.xlu0 %1602  ;;  %v1744_v36 = vmul.f32 %v1736_v31, %v3776_v25  ;;  %v1745_v26 = vmul.f32 %v1740_v5, %v3778_v34 }
 0x212   : > { %v1609_v42 = vsel %vm880_vm3, %v1595_v43, %v1603_v6  ;;  %v1613_v49 = vsel %vm880_vm3, %v1603_v6, %v1595_v43  ;;  %v2342_v21 = vpack.c.bf16 %v1081_v35, %v1079_v20  ;;  %v2344_v56 = vpack.c.bf16 %v1080_v19, %v1078_v4 }
 0x213   : > { %v1618_v7 = vmul.f32 %v1613_v49, %v3767_v1  ;;  %v1619_v23 = vmul.f32 %v1609_v42, %v3769_v16  ;;  %v1752_v62 = vadd.f32 %v1744_v36, %v1624_v12  ;;  %v1753_v43 = vadd.f32 %v1745_v26, %v1625_v40 }
 0x214   : > { %2343 = vmatprep.subr.bf16.mxu1 %v2342_v21 }
 0x215   : > { %v1723_v44 = vpop.permute.xlu0 %1722  ;;  %2345 = vmatpush1.bf16.msra.mxu1 %v2344_v56  ;;  %v1626_v29 = vadd.f32 %v1618_v7, %v3668_v30  ;;  %v1627_v11 = vadd.f32 %v1619_v23, %v3671_v18  ;;  %v1760_v15 = vmax.f32 %v1752_v62, 0.0  ;;  %v1761_v48 = vmax.f32 %v1753_v43, 0.0 }
 0x216   : > { %v869_v53 = vpop.permute.xlu1 %868 }
 0x217   : > { %v3842_v27 = vmin.f32 %v1760_v15, 6.0  ;;  %v3844_v58 = vmin.f32 %v1761_v48, 6.0 }
 0x219   : > { %v1731_v45 = vpop.permute.xlu0 %1730 }
 0x21a   : > { %v1737_v39 = vsel %vm1027_vm4, %v1723_v44, %v1731_v45  ;;  %v1741_v55 = vsel %vm1027_vm4, %v1731_v45, %v1723_v44  ;;  %v877_v54 = vpop.permute.xlu1 %876 }
 0x21b   : > { %v1746_v13 = vmul.f32 %v1737_v39, %v3776_v25  ;;  %v1747_v0 = vmul.f32 %v1741_v55, %v3778_v34  ;;  %v883_v4 = vsel %vm880_vm3, %v869_v53, %v877_v54  ;;  %v887_v20 = vsel %vm880_vm3, %v877_v54, %v869_v53 }
 0x21c   : > { %v911_v41 = vmul.f32 %v3767_v1, %v887_v20  ;;  %v912_v59 = vmul.f32 %v3769_v16, %v883_v4 }
 0x21d   : > { %v1754_v47 = vadd.f32 %v1746_v13, %v1626_v29  ;;  %v1755_v38 = vadd.f32 %v1747_v0, %v1627_v11 }
 0x21e   : > { %v1016_v3 = vpop.permute.xlu1 %1015  ;;  %v919_v36 = vadd.f32 %v911_v41, %v3654_v50  ;;  %v920_v26 = vadd.f32 %v912_v59, %v3656_v51 }
 0x21f   : > { %v1762_v24 = vmax.f32 %v1754_v47, 0.0  ;;  %v1763_v28 = vmax.f32 %v1755_v38, 0.0 }
 0x221   : > { %v3846_v22 = vmin.f32 %v1762_v24, 6.0  ;;  %v3848_v30 = vmin.f32 %v1763_v28, 6.0 }
 0x222   : > { %v1024_v18 = vpop.permute.xlu1 %1023 }
 0x223   : > { %v871_v19 = vpop.permute.xlu0 %870  ;;  %v2358_v35 = vpack.c.bf16 %v3848_v30, %v3844_v58  ;;  %v2360_v6 = vpack.c.bf16 %v3846_v22, %v3842_v27  ;;  %v1030_v32 = vsel %vm1027_vm4, %v1016_v3, %v1024_v18  ;;  %v1034_v60 = vsel %vm1027_vm4, %v1024_v18, %v1016_v3 }
 0x224   : > { %v1058_v56 = vmul.f32 %v3776_v25, %v1030_v32  ;;  %v1059_v17 = vmul.f32 %v3778_v34, %v1034_v60 }
 0x226   : > { %v1597_v31 = vpop.permute.xlu1 %1596  ;;  %v1066_v12 = vadd.f32 %v1058_v56, %v919_v36  ;;  %v1067_v40 = vadd.f32 %v1059_v17, %v920_v26 }
 0x227   : > { %v879_v5 = vpop.permute.xlu0 %878 }
 0x228   : > { %v884_v42 = vsel %vm880_vm3, %v871_v19, %v879_v5  ;;  %v888_v49 = vsel %vm880_vm3, %v879_v5, %v871_v19  ;;  %v1074_v55 = vmax.f32 %v1066_v12, 0.0  ;;  %v1075_v54 = vmax.f32 %v1067_v40, 0.0 }
 0x229   : > { %v913_v44 = vmul.f32 %v3767_v1, %v888_v49  ;;  %v914_v53 = vmul.f32 %v3769_v16, %v884_v42 }
 0x22a   : > { %v1605_v21 = vpop.permute.xlu1 %1604  ;;  %v1082_v38 = vmin.f32 %v1074_v55, 6.0  ;;  %v3952_v55 = vld [vmem:[%s374_s22 + $0x20] sm:$0xff] }
 0x22b   : > { %v1018_v46 = vpop.permute.xlu0 %1017  ;;  %v921_v45 = vadd.f32 %v913_v44, %v3589_v52  ;;  %v922_v50 = vadd.f32 %v914_v53, %v3587_v8  ;;  %v1610_v47 = vsel %vm880_vm3, %v1597_v31, %v1605_v21  ;;  %v1614_v52 = vsel %vm880_vm3, %v1605_v21, %v1597_v31 }
 0x22c   : > { %v1083_v8 = vmin.f32 %v1075_v54, 6.0  ;;  %v1620_v18 = vmul.f32 %v1614_v52, %v3767_v1  ;;  %v1621_v19 = vmul.f32 %v1610_v47, %v3769_v16 }
 0x22e   : > { %v1725_v7 = vpop.permute.xlu1 %1724  ;;  %v1628_v59 = vadd.f32 %v1620_v18, %v3695_v14  ;;  %v1629_v42 = vadd.f32 %v1621_v19, %v3697_v10  ;;  %v4286_v14 = vmov 0.0  }
 0x22f   : > { %v1026_v23 = vpop.permute.xlu0 %1025 }
 0x230   : > { %v1031_v62 = vsel %vm1027_vm4, %v1018_v46, %v1026_v23  ;;  %v1035_v43 = vsel %vm1027_vm4, %v1026_v23, %v1018_v46  ;;  %v3938_v23 = vld [vmem:[%s374_s22 + $0x18] sm:$0xff] }
 0x231   : > { %v1060_v51 = vmul.f32 %v3776_v25, %v1031_v62  ;;  %v1061_v39 = vmul.f32 %v3778_v34, %v1035_v43  ;;  %v3940_v62 = vld [vmem:[%s374_s22] sm:$0xff] }
 0x232   : > { %v1733_v48 = vpop.permute.xlu1 %1732 }
 0x233   : > { %v1068_v29 = vadd.f32 %v1060_v51, %v921_v45  ;;  %v1069_v11 = vadd.f32 %v1061_v39, %v922_v50  ;;  %v1599_v13 = vpop.permute.xlu0 %1598  ;;  %v1738_v58 = vsel %vm1027_vm4, %v1725_v7, %v1733_v48  ;;  %v1742_v30 = vsel %vm1027_vm4, %v1733_v48, %v1725_v7  ;;  %v3944_v45 = vld [vmem:[%s374_s22 + $0x10] sm:$0xff]  ;;  %v3948_v51 = vld [vmem:[%s374_s22 + $0x28] sm:$0xff]  ;;  %v3950_v39 = vld [vmem:[%s374_s22 + $0x38] sm:$0xff] }
 0x234   : > { %v1748_v32 = vmul.f32 %v1738_v58, %v3776_v25  ;;  %v1749_v60 = vmul.f32 %v1742_v30, %v3778_v34  ;;  %v2368_v50 = vpack.c.bf16 %v3944_v45, %v3940_v62  ;;  %v2370_v54 = vpack.c.bf16 %v3950_v39, %v3948_v51  ;;  %v2531_v48 = vld [vmem:[%s2647_s24 + $0x10] sm:$0xff] }
 0x235   : > { %v1076_v0 = vmax.f32 %v1068_v29, 0.0  ;;  %v1077_v15 = vmax.f32 %v1069_v11, 0.0  ;;  %v3956_v29 = vld [vmem:[%s374_s22 + $0x30] sm:$0xff] }
 0x236   : > { %v1756_v56 = vadd.f32 %v1748_v32, %v1628_v59  ;;  %v1757_v17 = vadd.f32 %v1749_v60, %v1629_v42  ;;  %v2372_v11 = vpack.c.bf16 %v3956_v29, %v3952_v55 }
 0x237   : > { %v1084_v3 = vmin.f32 %v1076_v0, 6.0  ;;  %v1085_v24 = vmin.f32 %v1077_v15, 6.0  ;;  %v1607_v28 = vpop.permute.xlu0 %1606 }
 0x238   : > { %v1611_v31 = vsel %vm880_vm3, %v1599_v13, %v1607_v28  ;;  %v1615_v5 = vsel %vm880_vm3, %v1607_v28, %v1599_v13  ;;  %v1765_v44 = vmax.f32 %v1757_v17, 0.0  ;;  %v2534_v28 = vld [vmem:[%s2647_s24] sm:$0xff] }
 0x239   : > { %v2346_v4 = vpack.c.bf16 %v1085_v24, %v1083_v8  ;;  %v2348_v20 = vpack.c.bf16 %v1084_v3, %v1082_v38  ;;  %v1622_v49 = vmul.f32 %v1615_v5, %v3767_v1  ;;  %v1623_v21 = vmul.f32 %v1611_v31, %v3769_v16  ;;  %v2532_v38 = vld [vmem:[%s2647_s24 + $0x8] sm:$0xff]  ;;  %v2533_v3 = vld [vmem:[%s2647_s24 + $0x18] sm:$0xff] }
 0x23b   : > { %v1727_v41 = vpop.permute.xlu0 %1726  ;;  %2347 = vmatprep.subr.bf16.mxu1 %v2346_v4  ;;  %v1630_v10 = vadd.f32 %v1622_v49, %v3717_v61  ;;  %v1631_v1 = vadd.f32 %v1623_v21, %v3719_v63  ;;  %v2535_v49 = vld [vmem:[%s2647_s24 + $0x30] sm:$0xff] }
 0x23c   : > { %2349 = vmatpush1.bf16.msra.mxu1 %v2348_v20 }
 0x23d   : > { %2359 = vmatprep.subr.bf16.mxu1 %v2358_v35  ;;  %v1764_v35 = vmax.f32 %v1756_v56, 0.0  ;;  %v2536_v56 = vld [vmem:[%s2647_s24 + $0x28] sm:$0xff] }
 0x23f   : > { %v1735_v46 = vpop.permute.xlu0 %1734  ;;  %2293 = vmatmul.mubr.msk.f32.vlgmr.msra.gmra.mrb[8].mxu1 %vm457_vm0, %v3680_v37  ;;  %v1772_v22 = vmin.f32 %v1764_v35, 6.0 }
 0x240   : > { %v1739_v36 = vsel %vm1027_vm4, %v1727_v41, %v1735_v46  ;;  %v1743_v26 = vsel %vm1027_vm4, %v1735_v46, %v1727_v41  ;;  %2361 = vmatpush1.bf16.msra.mxu1 %v2360_v6  ;;  %1172 = vmatprep.mubr.f32.mxu1 %v4286_v14  ;;  %v1773_v6 = vmin.f32 %v1765_v44, 6.0  ;;  %v2537_v46 = vld [vmem:[%s2647_s24 + $0x38] sm:$0xff] }
 0x241   : > { %v1750_v16 = vmul.f32 %v1739_v36, %v3776_v25  ;;  %v1751_v37 = vmul.f32 %v1743_v26, %v3778_v34 }
 0x243   : > { %v1758_v53 = vadd.f32 %v1750_v16, %v1630_v10  ;;  %v1759_v12 = vadd.f32 %v1751_v37, %v1631_v1  ;;  %2294 = vmatmul.mubr.msk.f32.gmra.mrb[10].mxu1 %vm457_vm0, %v3707_v57  ;;  %v1777_v57 = vpop.permute.xlu1 %1776  ;;  %v1779_v34 = vpop.permute.xlu0 %1778  ;;  %v2538_v10 = vld [vmem:[%s2647_s24 + $0x20] sm:$0xff] }
 0x244   : > { %1178 = vmatprep.mubr.f32.mxu1 %v4286_v14 }
 0x245   : > { %v1766_v33 = vmax.f32 %v1758_v53, 0.0  ;;  %v1767_v27 = vmax.f32 %v1759_v12, 0.0 }
 0x247   : > { %v1774_v61 = vmin.f32 %v1766_v33, 6.0  ;;  %v1775_v40 = vmin.f32 %v1767_v27, 6.0  ;;  %2295 = vmatmul.mubr.msk.f32.gmra.mrb[12].mxu1 %vm457_vm0, %v3689_v9  ;;  %v1781_v9 = vpop.permute.xlu1 %1780  ;;  %v1783_v7 = vpop.permute.xlu0 %1782  ;;  %v1889_v27 = vld [vmem:[%s4072_s8] sm:$0xff] }
 0x248   : > { %1184 = vmatprep.mubr.f32.mxu1 %v4286_v14 }
 0x249   : > { %v2362_v63 = vpack.c.bf16 %v1775_v40, %v1773_v6  ;;  %v2364_v25 = vpack.c.bf16 %v1774_v61, %v1772_v22  ;;  %v1890_v22 = vld [vmem:[%s4072_s8 + $0x8] sm:$0xff]  ;;  %v1891_v6 = vld [vmem:[%s4072_s8 + $0x10] sm:$0xff]  ;;  %v1892_v61 = vld [vmem:[%s4072_s8 + $0x18] sm:$0xff] }
 0x24a   : > { %v1893_v40 = vld [vmem:[%s4072_s8 + $0x20] sm:$0xff] }
 0x24b   : > { %2296 = vmatmul.mubr.msk.f32.gmra.mrb[14].mxu1 %vm457_vm0, %v3715_v2  ;;  %2363 = vmatprep.subr.bf16.mxu1 %v2362_v63  ;;  %v3936_v2 = vld [vmem:[%s374_s22 + $0x8] sm:$0xff]  ;;  %v404_v13 = vpop.permute.xlu1 %403 }
 0x24c   : > { %2365 = vmatpush1.bf16.msra.mxu1 %v2364_v25  ;;  %1856 = vmatprep.mubr.f32.mxu1 %v4286_v14  ;;  %v2366_v43 = vpack.c.bf16 %v3938_v23, %v3936_v2  ;;  %v422_v8 = vadd.f32 %v2532_v38, %v404_v13  ;;  %v421_v58 = vadd.f32 %v2534_v28, %v404_v13  ;;  %v1894_v63 = vld [vmem:[%s4072_s8 + $0x28] sm:$0xff]  ;;  %v1895_v25 = vld [vmem:[%s4072_s8 + $0x30] sm:$0xff] }
 0x24e   : > { %2367 = vmatprep.subr.bf16.mxu0 %v2366_v43 }
 0x24f   : > { %2301 = vmatmul.mubr.msk.f32.vlgmr.msra.gmra.mrb[8].mxu1 %vm457_vm0, %v1777_v57  ;;  %2369 = vmatpush1.bf16.msra.mxu0 %v2368_v50  ;;  %v1896_v57 = vld [vmem:[%s4072_s8 + $0x38] sm:$0xff] }
 0x250   : > { %1862 = vmatprep.mubr.f32.mxu1 %v4286_v14  ;;  %2371 = vmatprep.subr.bf16.mxu0 %v2370_v54 }
 0x252   : > { %v414_v30 = vpop.permute.xlu1 %413 }
 0x253   : > { %2302 = vmatmul.mubr.msk.f32.gmra.mrb[10].mxu1 %vm457_vm0, %v1779_v34  ;;  %2373 = vmatpush1.bf16.msra.mxu0 %v2372_v11  ;;  %v426_v17 = vadd.f32 %v2536_v56, %v414_v30  ;;  %v425_v1 = vadd.f32 %v2538_v10, %v414_v30 }
 0x254   : > { %1868 = vmatprep.mubr.f32.mxu1 %v4286_v14 }
 0x256   : > { %v419_v42 = vpop.permute.xlu1 %418 }
 0x257   : > { %2303 = vmatmul.mubr.msk.f32.gmra.mrb[12].mxu1 %vm457_vm0, %v1781_v9  ;;  %v427_v21 = vadd.f32 %v2535_v49, %v419_v42  ;;  %v428_v36 = vadd.f32 %v2537_v46, %v419_v42 }
 0x258   : > { %1874 = vmatprep.mubr.f32.mxu1 %v4286_v14  ;;  %v409_v0 = vpop.permute.xlu0 %408 }
 0x259   : > { %v423_v47 = vadd.f32 %v2531_v48, %v409_v0  ;;  %v424_v24 = vadd.f32 %v2533_v3, %v409_v0 }
 0x25a   : > { %v1913_v0 = vpop.permute.xlu1 %1912 }
 0x25b   : > { %2304 = vmatmul.mubr.msk.f32.gmra.mrb[14].mxu1 %vm457_vm0, %v1783_v7 }
 0x25c   : > { %v1908_v34 = vpop.permute.xlu0 %1907 }
 0x25e   : > { %v1923_v30 = vpop.permute.xlu1 %1922 }
 0x260   : > { %v1918_v38 = vpop.permute.xlu0 %1917 }
 0x322   : > { %v1858_v15 = vpop.f32.mrb[8].mxu1 }
 0x323   : > { %v1860_v52 = vpop.f32.mrb[9].mxu1  ;;  %v3970_v5 = vadd.f32 %v1858_v15, %v421_v58 }
 0x324   : > { %v3966_v20 = vadd.f32 %v1860_v52, %v422_v8 }
 0x326   : > { %v1864_v18 = vpop.f32.mrb[10].mxu1 }
 0x327   : > { %v3964_v19 = vadd.f32 %v1864_v18, %v423_v47  ;;  %v1866_v4 = vpop.f32.mrb[11].mxu1 }
 0x328   : > { %v3968_v31 = vadd.f32 %v1866_v4, %v424_v24 }
 0x329   : > { %v2376_v41 = vpack.c.bf16 %v3964_v19, %v3970_v5 }
 0x32a   : > { %v2374_v32 = vpack.c.bf16 %v3968_v31, %v3966_v20  ;;  %v1870_v60 = vpop.f32.mrb[12].mxu1 }
 0x32b   : > { %v1872_v59 = vpop.f32.mrb[13].mxu1  ;;  %v3986_v53 = vadd.f32 %v1870_v60, %v425_v1 }
 0x32c   : > { %2375 = vmatprep.subr.bf16.mxu0 %v2374_v32  ;;  %v3982_v35 = vadd.f32 %v1872_v59, %v426_v17  ;;  %v1928_v32 = vpop.permute.xlu0 %1927 }
 0x32d   : > { %2377 = vmatpush1.bf16.msra.mxu0 %v2376_v41 }
 0x32e   : > { %v1876_v26 = vpop.f32.mrb[14].mxu1 }
 0x32f   : > { %v3980_v16 = vadd.f32 %v1876_v26, %v427_v21  ;;  %v1878_v37 = vpop.f32.mrb[15].mxu1  ;;  %v1933_v26 = vpop.permute.xlu1 %1932 }
 0x330   : > { %v3984_v44 = vadd.f32 %v1878_v37, %v428_v36 }
 0x331   : > { %v2380_v33 = vpack.c.bf16 %v3980_v16, %v3986_v53 }
 0x332   : > { %v2378_v12 = vpack.c.bf16 %v3984_v44, %v3982_v35 }
 0x334   : > { %2379 = vmatprep.subr.bf16.mxu0 %v2378_v12 }
 0x335   : > { %2381 = vmatpush1.bf16.msra.mxu0 %v2380_v33 }
 0x338   : > { %2305 = vmatmul.mubr.msk.f32.vlgmr.msra.gmra.mrb[8].mxu0 %vm1945_vm5, %v1889_v27 }
 0x339   : > { %2040 = vmatprep.mubr.f32.mxu0 %v4286_v14 }
 0x33c   : > { %2306 = vmatmul.mubr.msk.f32.gmra.mrb[10].mxu0 %vm1945_vm5, %v1890_v22 }
 0x33d   : > { %2046 = vmatprep.mubr.f32.mxu0 %v4286_v14 }
 0x340   : > { %2307 = vmatmul.mubr.msk.f32.gmra.mrb[12].mxu0 %vm1945_vm5, %v1891_v6 }
 0x341   : > { %2052 = vmatprep.mubr.f32.mxu0 %v4286_v14 }
 0x344   : > { %2308 = vmatmul.mubr.msk.f32.gmra.mrb[14].mxu0 %vm1945_vm5, %v1892_v61 }
 0x345   : > { %2058 = vmatprep.mubr.f32.mxu0 %v4286_v14 }
 0x348   : > { %2309 = vmatmul.mubr.msk.f32.gmra.mrb[16].mxu0 %vm1945_vm5, %v1893_v40  ;;  %v1938_v40 = vpop.permute.xlu0 %1937 }
 0x349   : > { %2064 = vmatprep.mubr.f32.mxu0 %v4286_v14 }
 0x34c   : > { %2310 = vmatmul.mubr.msk.f32.gmra.mrb[18].mxu0 %vm1945_vm5, %v1894_v63 }
 0x34d   : > { %2070 = vmatprep.mubr.f32.mxu0 %v4286_v14 }
 0x350   : > { %2311 = vmatmul.mubr.msk.f32.gmra.mrb[20].mxu0 %vm1945_vm5, %v1895_v25 }
 0x351   : > { %2076 = vmatprep.mubr.f32.mxu0 %v4286_v14 }
 0x354   : > { %2312 = vmatmul.mubr.msk.f32.gmra.mrb[22].mxu0 %vm1945_vm5, %v1896_v57 }
 0x40b   : > { %v2036_v9 = vpop.f32.mrb[8].mxu0 }
 0x40c   : > { %v2037_v7 = vadd.f32 %v2036_v9, %v1908_v34  ;;  %v2038_v43 = vpop.f32.mrb[9].mxu0 }
 0x40d   : > { %v2039_v50 = vadd.f32 %v2038_v43, %v1908_v34 }
 0x40e   : > { %v2313_v11 = vmul.f32 -1.442695, %v2037_v7 }
 0x40f   : > { %v2042_v54 = vpop.f32.mrb[10].mxu0  ;;  %v2314_v15 = vmul.f32 -1.442695, %v2039_v50 }
 0x410   : > { %v2044_v13 = vpop.f32.mrb[11].mxu0  ;;  %v2043_v48 = vadd.f32 %v2042_v54, %v1913_v0  ;;  %2467 = vpow2.f32 %v2313_v11  ;;  %v1943_v11 = vpop.permute.xlu1 %1942 }
 0x411   : > { %v2045_v47 = vadd.f32 %v2044_v13, %v1913_v0  ;;  %2469 = vpow2.f32 %v2314_v15 }
 0x412   : > { %v2315_v8 = vmul.f32 -1.442695, %v2043_v48 }
 0x413   : > { %v2048_v52 = vpop.f32.mrb[12].mxu0  ;;  %v2316_v3 = vmul.f32 -1.442695, %v2045_v47 }
 0x414   : > { %v2050_v14 = vpop.f32.mrb[13].mxu0  ;;  %v2049_v24 = vadd.f32 %v2048_v52, %v1918_v38  ;;  %2471 = vpow2.f32 %v2315_v8 }
 0x415   : > { %v2051_v18 = vadd.f32 %v2050_v14, %v1918_v38  ;;  %2473 = vpow2.f32 %v2316_v3 }
 0x416   : > { %v2317_v60 = vmul.f32 -1.442695, %v2049_v24 }
 0x417   : > { %v2054_v28 = vpop.f32.mrb[14].mxu0  ;;  %v2318_v49 = vmul.f32 -1.442695, %v2051_v18 }
 0x418   : > { %v2056_v58 = vpop.f32.mrb[15].mxu0  ;;  %v2055_v4 = vadd.f32 %v2054_v28, %v1923_v30  ;;  %2475 = vpow2.f32 %v2317_v60 }
 0x419   : > { %v2057_v27 = vadd.f32 %v2056_v58, %v1923_v30 }
 0x41a   : > { %v2468_v56 = vpop.eup %2467  ;;  %v2319_v17 = vmul.f32 -1.442695, %v2055_v4 }
 0x41b   : > { %v2060_v41 = vpop.f32.mrb[16].mxu0  ;;  %v2470_v36 = vpop.eup %2469  ;;  %v2131_v33 = vadd.f32 1.0, %v2468_v56  ;;  %v2320_v43 = vmul.f32 -1.442695, %v2057_v27 }
 0x41c   : > { %v2061_v59 = vadd.f32 %v2060_v41, %v1928_v32  ;;  %v2062_v42 = vpop.f32.mrb[17].mxu0  ;;  %v2132_v6 = vadd.f32 1.0, %v2470_v36 }
 0x41d   : > { %v2063_v21 = vadd.f32 %v2062_v42, %v1928_v32 }
 0x41e   : > { %v2321_v46 = vmul.f32 -1.442695, %v2061_v59  ;;  %v2472_v57 = vpop.eup %2471 }
 0x41f   : > { %v2322_v10 = vmul.f32 -1.442695, %v2063_v21  ;;  %v2066_v1 = vpop.f32.mrb[18].mxu0  ;;  %v2474_v7 = vpop.eup %2473  ;;  %v2133_v13 = vadd.f32 1.0, %v2472_v57 }
 0x420   : > { %2477 = vpow2.f32 %v2321_v46  ;;  %v2067_v37 = vadd.f32 %v2066_v1, %v1933_v26  ;;  %v2068_v12 = vpop.f32.mrb[19].mxu0  ;;  %v2134_v48 = vadd.f32 1.0, %v2474_v7 }
 0x421   : > { %2479 = vpow2.f32 %v2318_v49  ;;  %v2069_v22 = vadd.f32 %v2068_v12, %v1933_v26 }
 0x422   : > { %2481 = vpow2.f32 %v2319_v17  ;;  %v2323_v61 = vmul.f32 -1.442695, %v2067_v37  ;;  %v2476_v14 = vpop.eup %2475 }
 0x423   : > { %2483 = vpow2.f32 %v2322_v10  ;;  %v2324_v63 = vmul.f32 -1.442695, %v2069_v22  ;;  %v2072_v25 = vpop.f32.mrb[20].mxu0  ;;  %v2135_v32 = vadd.f32 1.0, %v2476_v14 }
 0x424   : > { %2485 = vpow2.f32 %v2323_v61  ;;  %v2073_v34 = vadd.f32 %v2072_v25, %v1938_v40  ;;  %v2074_v9 = vpop.f32.mrb[21].mxu0 }
 0x425   : > { %2487 = vrcp.f32 %v2131_v33  ;;  %v2075_v50 = vadd.f32 %v2074_v9, %v1938_v40 }
 0x426   : > { %2489 = vrcp.f32 %v2132_v6  ;;  %v2325_v54 = vmul.f32 -1.442695, %v2073_v34 }
 0x427   : > { %2491 = vpow2.f32 %v2324_v63  ;;  %v2326_v0 = vmul.f32 -1.442695, %v2075_v50  ;;  %v2078_v15 = vpop.f32.mrb[22].mxu0 }
 0x428   : > { %2493 = vpow2.f32 %v2325_v54  ;;  %v2079_v47 = vadd.f32 %v2078_v15, %v1943_v11  ;;  %v2080_v52 = vpop.f32.mrb[23].mxu0 }
 0x429   : > { %2495 = vpow2.f32 %v2320_v43  ;;  %v2081_v38 = vadd.f32 %v2080_v52, %v1943_v11 }
 0x42a   : > { %v2478_v8 = vpop.eup %2477  ;;  %2497 = vpow2.f32 %v2326_v0  ;;  %v2327_v3 = vmul.f32 -1.442695, %v2079_v47 }
 0x42b   : > { %v2480_v24 = vpop.eup %2479  ;;  %2499 = vrcp.f32 %v2133_v13  ;;  %v2139_v28 = vadd.f32 1.0, %v2478_v8  ;;  %v2328_v58 = vmul.f32 -1.442695, %v2081_v38 }
 0x42c   : > { %v2482_v30 = vpop.eup %2481  ;;  %2501 = vrcp.f32 %v2134_v48  ;;  %v2136_v59 = vadd.f32 1.0, %v2480_v24 }
 0x42d   : > { %v2484_v18 = vpop.eup %2483  ;;  %2503 = vrcp.f32 %v2139_v28  ;;  %v2137_v1 = vadd.f32 1.0, %v2482_v30 }
 0x42e   : > { %v2486_v4 = vpop.eup %2485  ;;  %v2140_v60 = vadd.f32 1.0, %v2484_v18  ;;  %2505 = vpow2.f32 %v2327_v3 }
 0x42f   : > { %v2488_v41 = vpop.eup %2487  ;;  %v2141_v42 = vadd.f32 1.0, %v2486_v4  ;;  %2507 = vpow2.f32 %v2328_v58 }
 0x430   : > { %v2490_v49 = vpop.eup %2489  ;;  %2509 = vrcp.f32 %v2140_v60  ;;  %v2179_v6 = vmul.f32 %v2488_v41, %v3940_v62 }
 0x431   : > { %v2492_v21 = vpop.eup %2491  ;;  %2511 = vrcp.f32 %v2141_v42  ;;  %v2180_v7 = vmul.f32 %v2490_v49, %v3936_v2 }
 0x432   : > { %v2494_v56 = vpop.eup %2493  ;;  %2513 = vrcp.f32 %v2135_v32  ;;  %v2142_v17 = vadd.f32 1.0, %v2492_v21 }
 0x433   : > { %v2496_v46 = vpop.eup %2495  ;;  %2515 = vrcp.f32 %v2136_v59  ;;  %v2143_v36 = vadd.f32 1.0, %v2494_v56 }
 0x434   : > { %v2498_v26 = vpop.eup %2497  ;;  %2517 = vrcp.f32 %v2142_v17  ;;  %v2138_v33 = vadd.f32 1.0, %v2496_v46 }
 0x435   : > { %v2500_v10 = vpop.eup %2499  ;;  %2519 = vrcp.f32 %v2143_v36  ;;  %v2144_v37 = vadd.f32 1.0, %v2498_v26 }
 0x436   : > { %v2502_v12 = vpop.eup %2501  ;;  %v2181_v43 = vmul.f32 %v2500_v10, %v3944_v45 }
 0x437   : > { %v2504_v27 = vpop.eup %2503  ;;  %2521 = vrcp.f32 %v2144_v37  ;;  %v2182_v2 = vmul.f32 %v2502_v12, %v3938_v23 }
 0x438   : > { %v2506_v22 = vpop.eup %2505  ;;  %v2187_v61 = vmul.f32 %v2504_v27, %v3970_v5  ;;  %2523 = vrcp.f32 %v2137_v1 }
 0x439   : > { %v2508_v40 = vpop.eup %2507  ;;  %v2145_v63 = vadd.f32 1.0, %v2506_v22  ;;  %2525 = vrcp.f32 %v2138_v33 }
 0x43a   : > { %v2510_v25 = vpop.eup %2509  ;;  %v2195_v57 = vadd.f32 %v2187_v61, %v2179_v6  ;;  %v2146_v34 = vadd.f32 1.0, %v2508_v40 }
 0x43b   : > { %v2512_v9 = vpop.eup %2511  ;;  %v2188_v62 = vmul.f32 %v2510_v25, %v3966_v20  ;;  %2527 = vrcp.f32 %v2145_v63 }
 0x43c   : > { %v2514_v5 = vpop.eup %2513  ;;  %2203 = vst [vmem:[%s4037_s23] sm:$0xff] %v2195_v57  ;;  %v2189_v50 = vmul.f32 %v2512_v9, %v3964_v19  ;;  %2529 = vrcp.f32 %v2146_v34 }
 0x43d   : > { %v2516_v54 = vpop.eup %2515  ;;  %v2196_v11 = vadd.f32 %v2188_v62, %v2180_v7  ;;  %v2183_v48 = vmul.f32 %v2514_v5, %v3952_v55 }
 0x43e   : > { %v2518_v13 = vpop.eup %2517  ;;  %v2197_v0 = vadd.f32 %v2189_v50, %v2181_v43  ;;  %v2184_v52 = vmul.f32 %v2516_v54, %v3948_v51 }
 0x43f   : > { %v2520_v15 = vpop.eup %2519  ;;  %2204 = vst [vmem:[%s4037_s23 + $0x8] sm:$0xff] %v2196_v11  ;;  %v2190_v20 = vmul.f32 %v2518_v13, %v3968_v31 }
 0x440   : > { %2205 = vst [vmem:[%s4037_s23 + $0x10] sm:$0xff] %v2197_v0  ;;  %v2191_v45 = vmul.f32 %v2520_v15, %v3986_v53 }
 0x441   : > { %v2522_v19 = vpop.eup %2521  ;;  %v2198_v47 = vadd.f32 %v2190_v20, %v2182_v2 }
 0x442   : > { %v2199_v14 = vadd.f32 %v2191_v45, %v2183_v48  ;;  %v2192_v38 = vmul.f32 %v2522_v19, %v3982_v35  ;;  %v2524_v8 = vpop.eup %2523 }
 0x443   : > { %2206 = vst [vmem:[%s4037_s23 + $0x18] sm:$0xff] %v2198_v47  ;;  %v2526_v23 = vpop.eup %2525  ;;  %v2185_v24 = vmul.f32 %v2524_v8, %v3956_v29 }
 0x444   : > { %2207 = vst [vmem:[%s4037_s23 + $0x20] sm:$0xff] %v2199_v14  ;;  %v2200_v31 = vadd.f32 %v2192_v38, %v2184_v52  ;;  %v2186_v28 = vmul.f32 %v2526_v23, %v3950_v39 }
 0x445   : > { %v2528_v3 = vpop.eup %2527 }
 0x446   : > { %v2530_v55 = vpop.eup %2529  ;;  %2208 = vst [vmem:[%s4037_s23 + $0x28] sm:$0xff] %v2200_v31  ;;  %v2193_v53 = vmul.f32 %v2528_v3, %v3980_v16 }
 0x447   : > { %v2194_v51 = vmul.f32 %v2530_v55, %v3984_v44 }
 0x448   : > { %v2201_v58 = vadd.f32 %v2193_v53, %v2185_v24 }
 0x449   : > { %v2202_v30 = vadd.f32 %v2194_v51, %v2186_v28 }
 0x44a   : > { %2209 = vst [vmem:[%s4037_s23 + $0x30] sm:$0xff] %v2201_v58 }
 0x44b   : > { %2210 = vst [vmem:[%s4037_s23 + $0x38] sm:$0xff] %v2202_v30 }
 0x44c PF: > { %s20_s13 = sadd.s32 1, %s2545_s13  }
 0x44d   : > { %p17_p4 = scmp.ge.s32.totalorder %s20_s13, 4  }
 0x44f   :  { %19 = sbr.rel (!%p17_p4) target bundleno = 1 (0x1), region = 93 }

</bundles_post_ra>
